<compile_context>
chip_gen: v6e
topology: v6e:2x2x1
jax: 0.10.0
libtpu: 0.0.40
codegen_flags: <defaults>
</compile_context>

<pallas_src>
import jax
import jax.numpy as jnp
from jax.experimental import pallas as pl
from jax.experimental.pallas import tpu as pltpu

EPS = 1e-5
LANE = 128


def _round_up(x, m):
    return (x + m - 1) // m * m


def _pad_last(a, target):
    pad = target - a.shape[-1]
    if pad == 0:
        return a
    return jnp.pad(a, [(0, 0)] * (a.ndim - 1) + [(0, pad)])


def _detect_vmem_limit():
    """Per-generation VMEM limit: ~3/4 of physical, capped at 112 MiB."""
    cap = 64 * 1024 * 1024
    try:
        info = pltpu.get_tpu_info()
        cap = int(getattr(info, "vmem_capacity_bytes", cap))
    except Exception:
        pass
    return int(min(cap * 3 // 4, 112 * 1024 * 1024))


VMEM_LIMIT = _detect_vmem_limit()


def _pick_hw_block(hw):
    """Largest clean divisor of HW from a multiple-of-8 candidate list (else whole)."""
    for blk in (1024, 512, 256, 128, 64, 32, 16, 8):
        if hw % blk == 0:
            return blk
    return hw


def _affine_from_stats(sum_row, ssq_row, gamma, beta, inv_m):
    """(scale, shift) s.t. y*scale + shift == (y - mu) * rsqrt(var+eps) * gamma + beta.
    gamma/beta are zero-padded on padded lanes -> scale=shift=0 there."""
    mu = sum_row * inv_m
    var = ssq_row * inv_m - mu * mu
    scale = gamma * jax.lax.rsqrt(var + EPS)
    shift = beta - mu * scale
    return scale, shift


# ---------------------------------------------------------------------------
# Kernel A: fused conv1 + conv3 (one bf16 MXU dot against the concatenated weight)
# + BN stats for both. y3 is NOT written to HBM (only its stats are kept).
# grid = (N, HW//hw_blk), both axes "arbitrary" (stats accumulate sequentially).
# ---------------------------------------------------------------------------
def _make_conv13_stats_kernel(Cp):
    def kernel(p1_ref, w13_ref, y1_ref, st_ref):
        y = jnp.dot(p1_ref[0], w13_ref[...], preferred_element_type=jnp.float32)
        y1 = y[:, :Cp]          # conv1 output block
        y3 = y[:, Cp:]          # conv3 (1x1 shortcut) output block -- stats only
        y1_ref[0] = y1.astype(y1_ref.dtype)

        @pl.when(jnp.logical_and(pl.program_id(0) == 0, pl.program_id(1) == 0))
        def _():
            st_ref[...] = jnp.zeros_like(st_ref)

        # rows: [sum(y1), sum(y1^2), sum(y3), sum(y3^2)] -- revisited accumulator block
        st_ref[...] += jnp.concatenate(
            [jnp.sum(y1, axis=0, keepdims=True),
             jnp.sum(y1 * y1, axis=0, keepdims=True),
             jnp.sum(y3, axis=0, keepdims=True),
             jnp.sum(y3 * y3, axis=0, keepdims=True)],
            axis=0,
        )

    return kernel


# ---------------------------------------------------------------------------
# Kernel B: bn1(affine, hoisted) + relu fused into conv2 (3x3, stride 1, pad 1)
# + conv2's BN stats. conv2 = 9 shifted bf16 MXU dots from a halo-padded VMEM
# scratch, accumulated into an f32 VMEM scratch (no SSA accumulator / vreg spill).
# grid = (N,)  [arbitrary: stats accumulate sequentially across samples]
# ---------------------------------------------------------------------------
def _make_bn1_conv2_kernel(Ho, Wo, Cp):
    def kernel(y1_ref, sc1_ref, sh1_ref, w2_ref, y2_ref, st2_ref, h1p_ref, acc_ref):
        n = pl.program_id(0)

        @pl.when(n == 0)
        def _():
            # zero once: the halo ring (and the W padding columns) stay zero,
            # the interior is fully overwritten every step
            h1p_ref[...] = jnp.zeros_like(h1p_ref)
            st2_ref[...] = jnp.zeros_like(st2_ref)

        # bn1 + relu with host-computed (scale, shift)
        h1 = jnp.maximum(
            y1_ref[0].astype(jnp.float32) * sc1_ref[...] + sh1_ref[...], 0.0)
        h1p_ref[1:Ho + 1, 1:Wo + 1, :] = h1

        # conv2: 9 shifted bf16 taps -> MXU dots -> f32 VMEM accumulator
        first = True
        for kh in range(3):
            for kw in range(3):
                tap = h1p_ref[kh:kh + Ho, kw:kw + Wo, :].astype(jnp.bfloat16)
                d = jnp.dot(tap.reshape(Ho * Wo, Cp), w2_ref[kh, kw],
                            preferred_element_type=jnp.float32)
                if first:
                    acc_ref[...] = d
                    first = False
                else:
                    acc_ref[...] += d

        acc = acc_ref[...]
        y2_ref[0] = acc.astype(y2_ref.dtype)
        st2_ref[...] += jnp.concatenate(
            [jnp.sum(acc, axis=0, keepdims=True),
             jnp.sum(acc * acc, axis=0, keepdims=True)],
            axis=0,
        )

    return kernel


# ---------------------------------------------------------------------------
# Kernel C: recompute y3 = conv3(x_strided) (tiny 1x1 dot, K=Cin) then
# bn2(y2) + bn3(y3) + add + relu, all with hoisted affines. Fully parallel grid.
# ---------------------------------------------------------------------------
def _bn_add_relu_kernel(y2_ref, xs_ref, w3_ref, sc2_ref, sh2_ref, sc3_ref, sh3_ref,
                        o_ref):
    y3 = jnp.dot(xs_ref[0], w3_ref[...], preferred_element_type=jnp.float32)
    y2 = y2_ref[0].astype(jnp.float32)
    o_ref[0] = jnp.maximum(
        y2 * sc2_ref[...] + sh2_ref[...] + y3 * sc3_ref[...] + sh3_ref[...], 0.0
    ).astype(o_ref.dtype)


# ---------------------------------------------------------------------------
# JAX glue
# ---------------------------------------------------------------------------
def _im2col3(x_nhwc, stride):
    """3x3, pad=1 patches with (kh, kw, cin) column ordering -> (N, Ho*Wo, 9*Cin)."""
    N, H, W, C = x_nhwc.shape
    xp = jnp.pad(x_nhwc, ((0, 0), (1, 1), (1, 1), (0, 0)))
    Ho = (H - 1) // stride + 1
    Wo = (W - 1) // stride + 1
    cols = [xp[:, kh:kh + stride * Ho:stride, kw:kw + stride * Wo:stride, :]
            for kh in range(3) for kw in range(3)]
    p = jnp.concatenate(cols, axis=-1)
    return p.reshape(N, Ho * Wo, 9 * C), Ho, Wo


def init_params(key, in_channels, out_channels):
    ks = jax.random.split(key, 6)

    def conv_w(k, kh, kw, cin, cout):
        bound = 1.0 / (kh * kw * cin) ** 0.5
        return jax.random.uniform(k, (kh, kw, cin, cout), jnp.float32, -bound, bound)

    def conv_b(k, kh, kw, cin, cout):
        bound = 1.0 / (kh * kw * cin) ** 0.5
        return jax.random.uniform(k, (1, cout), jnp.float32, -bound, bound)

    C = out_channels
    return dict(
        # conv biases kept only for the pure-JAX reference; the Pallas path drops
        # them (a per-channel constant before training-mode BN is exactly cancelled).
        w1=conv_w(ks[0], 3, 3, in_channels, C), b1=conv_b(ks[1], 3, 3, in_channels, C),
        w2=conv_w(ks[2], 3, 3, C, C),           b2=conv_b(ks[3], 3, 3, C, C),
        w3=conv_w(ks[4], 1, 1, in_channels, C), b3=conv_b(ks[5], 1, 1, in_channels, C),
        g1=jnp.ones((1, C), jnp.float32), be1=jnp.zeros((1, C), jnp.float32),
        g2=jnp.ones((1, C), jnp.float32), be2=jnp.zeros((1, C), jnp.float32),
        g3=jnp.ones((1, C), jnp.float32), be3=jnp.zeros((1, C), jnp.float32),
    )


def resblock_forward(x_nchw, params, stride):
    N, Cin, H, W = x_nchw.shape
    Cout = params["w1"].shape[-1]
    Cp = _round_up(Cout, LANE)                      # lane-dense output channels
    K9 = 9 * Cin

    x = jnp.transpose(x_nchw, (0, 2, 3, 1)).astype(jnp.float32)   # NCHW -> NHWC

    p1, Ho, Wo = _im2col3(x, stride)                               # (N, HW, 9*Cin)
    # centre tap (kh=kw=1) == strided subsample of x; only stream needed by kernel C
    xs = x[:, 0:stride * Ho:stride, 0:stride * Wo:stride, :].reshape(N, Ho * Wo, Cin)
    HW = Ho * Wo
    M = N * HW
    inv_m = 1.0 / M
    hw_blk = _pick_hw_block(HW)
    n_hw = HW // hw_blk

    p1 = p1.astype(jnp.bfloat16)
    xs = xs.astype(jnp.bfloat16)

    # channel-padded bf16 weights (padding MUST stay zero -> padded lanes stay 0)
    w1 = _pad_last(params["w1"].reshape(K9, Cout), Cp)             # (K9, Cp)
    w3 = _pad_last(params["w3"].reshape(Cin, Cout), Cp)            # (Cin, Cp)
    w3_rows = jnp.zeros((K9, Cp), jnp.float32).at[4 * Cin:5 * Cin, :].set(w3)
    w13 = jnp.concatenate([w1, w3_rows], axis=-1).astype(jnp.bfloat16)  # (K9, 2*Cp)
    w2 = jnp.pad(params["w2"],
                 ((0, 0), (0, 0), (0, Cp - Cout), (0, Cp - Cout))).astype(jnp.bfloat16)
    w3b = w3.astype(jnp.bfloat16)

    # BN affine params, zero-padded (=> padded lanes get scale=0, shift=0)
    g1, be1 = _pad_last(params["g1"], Cp), _pad_last(params["be1"], Cp)
    g2, be2 = _pad_last(params["g2"], Cp), _pad_last(params["be2"], Cp)
    g3, be3 = _pad_last(params["g3"], Cp), _pad_last(params["be3"], Cp)

    # --- stage A: conv1 (+ conv3-for-stats) + stats ------------------------
    y1, st13 = pl.pallas_call(
        _make_conv13_stats_kernel(Cp),
        grid=(N, n_hw),
        in_specs=[pl.BlockSpec((1, hw_blk, K9), lambda n, h: (n, h, 0)),
                  pl.BlockSpec((K9, 2 * Cp), lambda n, h: (0, 0))],
        out_specs=(pl.BlockSpec((1, hw_blk, Cp), lambda n, h: (n, h, 0)),
                   pl.BlockSpec((4, Cp), lambda n, h: (0, 0))),
        out_shape=(jax.ShapeDtypeStruct((N, HW, Cp), jnp.bfloat16),
                   jax.ShapeDtypeStruct((4, Cp), jnp.float32)),
        compiler_params=pltpu.CompilerParams(
            dimension_semantics=("arbitrary", "arbitrary"),
            vmem_limit_bytes=VMEM_LIMIT),
        cost_estimate=pl.CostEstimate(
            flops=2 * M * K9 * 2 * Cp, transcendentals=0,
            bytes_accessed=2 * M * K9 + 2 * M * Cp + 2 * K9 * 2 * Cp + 16 * Cp),
    )(p1, w13)

    # BN affines hoisted to plain JAX (tiny per-channel op, done once)
    sc1, sh1 = _affine_from_stats(st13[0:1], st13[1:2], g1, be1, inv_m)
    sc3, sh3 = _affine_from_stats(st13[2:3], st13[3:4], g3, be3, inv_m)

    # --- stage B: bn1 + relu + conv2 (halo + VMEM accumulator) + stats ------
    Wp = _round_up(Wo + 2, 8)                        # sublane-aligned halo width
    y1_nhwc = y1.reshape(N, Ho, Wo, Cp)
    y2, st2 = pl.pallas_call(
        _make_bn1_conv2_kernel(Ho, Wo, Cp),
        grid=(N,),
        in_specs=[pl.BlockSpec((1, Ho, Wo, Cp), lambda n: (n, 0, 0, 0)),
                  pl.BlockSpec((1, Cp), lambda n: (0, 0)),
                  pl.BlockSpec((1, Cp), lambda n: (0, 0)),
                  pl.BlockSpec((3, 3, Cp, Cp), lambda n: (0, 0, 0, 0))],
        out_specs=(pl.BlockSpec((1, HW, Cp), lambda n: (n, 0, 0)),
                   pl.BlockSpec((2, Cp), lambda n: (0, 0))),
        out_shape=(jax.ShapeDtypeStruct((N, HW, Cp), jnp.bfloat16),
                   jax.ShapeDtypeStruct((2, Cp), jnp.float32)),
        scratch_shapes=[pltpu.VMEM((Ho + 2, Wp, Cp), jnp.float32),
                        pltpu.VMEM((HW, Cp), jnp.float32)],
        compiler_params=pltpu.CompilerParams(
            dimension_semantics=("arbitrary",), vmem_limit_bytes=VMEM_LIMIT),
        cost_estimate=pl.CostEstimate(
            flops=2 * M * 9 * Cp * Cp, transcendentals=0,
            bytes_accessed=4 * M * Cp + 2 * 9 * Cp * Cp + 8 * Cp),
    )(y1_nhwc, sc1, sh1, w2)

    sc2, sh2 = _affine_from_stats(st2[0:1], st2[1:2], g2, be2, inv_m)

    # --- stage C: recompute y3 (1x1) + bn2 + bn3 + add + relu (parallel) ----
    out = pl.pallas_call(
        _bn_add_relu_kernel,
        grid=(N, n_hw),
        in_specs=[pl.BlockSpec((1, hw_blk, Cp), lambda n, h: (n, h, 0)),
                  pl.BlockSpec((1, hw_blk, Cin), lambda n, h: (n, h, 0)),
                  pl.BlockSpec((Cin, Cp), lambda n, h: (0, 0)),
                  pl.BlockSpec((1, Cp), lambda n, h: (0, 0)),
                  pl.BlockSpec((1, Cp), lambda n, h: (0, 0)),
                  pl.BlockSpec((1, Cp), lambda n, h: (0, 0)),
                  pl.BlockSpec((1, Cp), lambda n, h: (0, 0))],
        out_specs=pl.BlockSpec((1, hw_blk, Cp), lambda n, h: (n, h, 0)),
        out_shape=jax.ShapeDtypeStruct((N, HW, Cp), jnp.float32),
        compiler_params=pltpu.CompilerParams(
            dimension_semantics=("parallel", "parallel"),
            vmem_limit_bytes=VMEM_LIMIT),
        cost_estimate=pl.CostEstimate(
            flops=2 * M * Cin * Cp + 8 * M * Cp, transcendentals=0,
            bytes_accessed=2 * M * Cp + 2 * M * Cin + 4 * M * Cp + 2 * Cin * Cp),
    )(y2, xs, w3b, sc2, sh2, sc3, sh3)

    out = out[:, :, :Cout].reshape(N, Ho, Wo, Cout)
    return jnp.transpose(out, (0, 3, 1, 2))                        # NHWC -> NCHW


# ---------------------------------------------------------------------------
# Pure-JAX reference (uses the conv biases — the Pallas path drops them, which is
# mathematically equivalent under training-mode BN)
# ---------------------------------------------------------------------------
def resblock_ref(x_nchw, params, stride):
    hp = jax.lax.Precision.HIGHEST

    def conv(x, w, b, s, pad):
        y = jax.lax.conv_general_dilated(
            x, w, window_strides=(s, s), padding=((pad, pad), (pad, pad)),
            dimension_numbers=("NCHW", "HWIO", "NCHW"), precision=hp)
        return y + b.reshape(1, -1, 1, 1)

    def bn(y, g, b):
        mu = jnp.mean(y, axis=(0, 2, 3), keepdims=True)
        var = jnp.var(y, axis=(0, 2, 3), keepdims=True)
        return ((y - mu) * jax.lax.rsqrt(var + EPS) * g.reshape(1, -1, 1, 1)
                + b.reshape(1, -1, 1, 1))

    h = jax.nn.relu(bn(conv(x_nchw, params["w1"], params["b1"], stride, 1),
                       params["g1"], params["be1"]))
    out = bn(conv(h, params["w2"], params["b2"], 1, 1), params["g2"], params["be2"])
    sc = bn(conv(x_nchw, params["w3"], params["b3"], stride, 0), params["g3"], params["be3"])
    return jax.nn.relu(out + sc)


# ---------------------------------------------------------------------------
if __name__ == "__main__":
    key = jax.random.PRNGKey(0)
    kx, kp = jax.random.split(key)

    in_channels, out_channels, stride = 4, 8, 2
    x = jax.random.normal(kx, (2, in_channels, 16, 16), jnp.float32)  # NCHW like PyTorch
    params = init_params(kp, in_channels, out_channels)

    fwd = jax.jit(lambda xx: resblock_forward(xx, params, stride))
    out = jax.block_until_ready(fwd(x))

    assert out.shape == (2, out_channels, 8, 8), out.shape
    assert bool(jnp.all(jnp.isfinite(out)))
    assert bool(jnp.all(out >= 0.0))                    # final ReLU

    ref = resblock_ref(x, params, stride)
    max_err = float(jnp.max(jnp.abs(out - ref)))
    assert max_err < 1e-1, f"mismatch vs pure-JAX reference: max abs err = {max_err}"

    print("KERNEL_OK")
</pallas_src>

<mosaic_0001>
module attributes {stable_mosaic.version = 11 : i64} {
  func.func @kernel(%arg0: i32, %arg1: i32, %arg2: memref<1x64x36xbf16, #tpu.memory_space<vmem>>, %arg3: memref<36x256xbf16, #tpu.memory_space<vmem>>, %arg4: memref<1x64x128xbf16, #tpu.memory_space<vmem>>, %arg5: memref<4x128xf32, #tpu.memory_space<vmem>>) attributes {dimension_semantics = [#tpu.dimension_semantics<arbitrary>, #tpu.dimension_semantics<arbitrary>], iteration_bounds = array<i64: 2, 1>, scalar_prefetch = 0 : i64, scratch_operands = 0 : i64, tpu.core_type = #tpu.core_type<tc>, window_params = [{transform_indices = @transform_0, window_bounds = array<i64: 1, 64, 36>}, {pipeline_mode = #tpu.pipeline_mode<synchronous>, transform_indices = @transform_1, window_bounds = array<i64: 36, 256>}, {transform_indices = @transform_2, window_bounds = array<i64: 1, 64, 128>}, {pipeline_mode = #tpu.pipeline_mode<synchronous>, transform_indices = @transform_3, window_bounds = array<i64: 4, 128>}]} {
    %c0 = arith.constant 0 : index
    %c0_0 = arith.constant 0 : index
    %c0_1 = arith.constant 0 : index
    %0 = vector.load %arg2[%c0, %c0_0, %c0_1] : memref<1x64x36xbf16, #tpu.memory_space<vmem>>, vector<1x64x36xbf16>
    %1 = vector.shape_cast %0 : vector<1x64x36xbf16> to vector<64x36xbf16>
    %c0_2 = arith.constant 0 : index
    %c0_3 = arith.constant 0 : index
    %2 = vector.load %arg3[%c0_2, %c0_3] : memref<36x256xbf16, #tpu.memory_space<vmem>>, vector<36x256xbf16>
    %cst = arith.constant dense<0.000000e+00> : vector<64x256xf32>
    %3 = tpu.matmul %1, %2, %cst {dimension_numbers = #tpu.dot_dimension_numbers<[1], [0], [0], [1], [0, 0, 1, 1], [], []>} : vector<64x36xbf16>, vector<36x256xbf16>, vector<64x256xf32> -> vector<64x256xf32>
    %4 = vector.extract_strided_slice %3 {offsets = [0, 0], sizes = [64, 128], strides = [1, 1]} : vector<64x256xf32> to vector<64x128xf32>
    %5 = vector.extract_strided_slice %3 {offsets = [0, 128], sizes = [64, 128], strides = [1, 1]} : vector<64x256xf32> to vector<64x128xf32>
    %6 = arith.truncf %4 : vector<64x128xf32> to vector<64x128xbf16>
    %c0_4 = arith.constant 0 : index
    %c0_5 = arith.constant 0 : index
    %c0_6 = arith.constant 0 : index
    %7 = vector.load %arg4[%c0_4, %c0_5, %c0_6] : memref<1x64x128xbf16, #tpu.memory_space<vmem>>, vector<1x64x128xbf16>
    %8 = vector.shape_cast %7 : vector<1x64x128xbf16> to vector<64x128xbf16>
    %9 = vector.shape_cast %6 : vector<64x128xbf16> to vector<1x64x128xbf16>
    tpu.vector_store %arg4[%c0_4, %c0_5, %c0_6], %9 {strides = array<i32>} : memref<1x64x128xbf16, #tpu.memory_space<vmem>>, vector<1x64x128xbf16>,
    %c0_i32 = arith.constant 0 : i32
    %10 = arith.cmpi eq, %arg0, %c0_i32 : i32
    %c0_i32_7 = arith.constant 0 : i32
    %11 = arith.cmpi eq, %arg1, %c0_i32_7 : i32
    %12 = arith.andi %10, %11 : i1
    %13 = arith.extui %12 : i1 to i32
    %c0_i32_8 = arith.constant 0 : i32
    %14 = arith.cmpi ne, %13, %c0_i32_8 : i32
    scf.if %14 {
      %cst_17 = arith.constant 0.000000e+00 : f32
      %29 = vector.broadcast %cst_17 : f32 to vector<4x128xf32>
      %c0_18 = arith.constant 0 : index
      %c0_19 = arith.constant 0 : index
      %30 = vector.load %arg5[%c0_18, %c0_19] : memref<4x128xf32, #tpu.memory_space<vmem>>, vector<4x128xf32>
      tpu.vector_store %arg5[%c0_18, %c0_19], %29 {strides = array<i32>} : memref<4x128xf32, #tpu.memory_space<vmem>>, vector<4x128xf32>,
    } else {
    }
    %c0_9 = arith.constant 0 : index
    %c0_10 = arith.constant 0 : index
    %15 = vector.load %arg5[%c0_9, %c0_10] : memref<4x128xf32, #tpu.memory_space<vmem>>, vector<4x128xf32>
    %cst_11 = arith.constant dense<0.000000e+00> : vector<128xf32>
    %16 = vector.multi_reduction <add>, %4, %cst_11 [0] : vector<64x128xf32> to vector<128xf32>
    %17 = vector.shape_cast %16 : vector<128xf32> to vector<1x128xf32>
    %18 = arith.mulf %4, %4 : vector<64x128xf32>
    %cst_12 = arith.constant dense<0.000000e+00> : vector<128xf32>
    %19 = vector.multi_reduction <add>, %18, %cst_12 [0] : vector<64x128xf32> to vector<128xf32>
    %20 = vector.shape_cast %19 : vector<128xf32> to vector<1x128xf32>
    %cst_13 = arith.constant dense<0.000000e+00> : vector<128xf32>
    %21 = vector.multi_reduction <add>, %5, %cst_13 [0] : vector<64x128xf32> to vector<128xf32>
    %22 = vector.shape_cast %21 : vector<128xf32> to vector<1x128xf32>
    %23 = arith.mulf %5, %5 : vector<64x128xf32>
    %cst_14 = arith.constant dense<0.000000e+00> : vector<128xf32>
    %24 = vector.multi_reduction <add>, %23, %cst_14 [0] : vector<64x128xf32> to vector<128xf32>
    %25 = vector.shape_cast %24 : vector<128xf32> to vector<1x128xf32>
    %26 = tpu.concatenate %17, %20, %22, %25 in 0 : vector<1x128xf32>, vector<1x128xf32>, vector<1x128xf32>, vector<1x128xf32> -> vector<4x128xf32>
    %27 = arith.addf %15, %26 : vector<4x128xf32>
    %c0_15 = arith.constant 0 : index
    %c0_16 = arith.constant 0 : index
    %28 = vector.load %arg5[%c0_15, %c0_16] : memref<4x128xf32, #tpu.memory_space<vmem>>, vector<4x128xf32>
    tpu.vector_store %arg5[%c0_15, %c0_16], %27 {strides = array<i32>} : memref<4x128xf32, #tpu.memory_space<vmem>>, vector<4x128xf32>,
    return
  }
  func.func @transform_0(%arg0: i32, %arg1: i32) -> (i32, i32, i32) {
    %c0_i32 = arith.constant 0 : i32
    %c0_i32_0 = arith.constant 0 : i32
    return %arg0, %arg1, %c0_i32 : i32, i32, i32
  }
  func.func @transform_1(%arg0: i32, %arg1: i32) -> (i32, i32) {
    %c0_i32 = arith.constant 0 : i32
    %c0_i32_0 = arith.constant 0 : i32
    %c0_i32_1 = arith.constant 0 : i32
    return %c0_i32, %c0_i32_0 : i32, i32
  }
  func.func @transform_2(%arg0: i32, %arg1: i32) -> (i32, i32, i32) {
    %c0_i32 = arith.constant 0 : i32
    %c0_i32_0 = arith.constant 0 : i32
    return %arg0, %arg1, %c0_i32 : i32, i32, i32
  }
  func.func @transform_3(%arg0: i32, %arg1: i32) -> (i32, i32) {
    %c0_i32 = arith.constant 0 : i32
    %c0_i32_0 = arith.constant 0 : i32
    %c0_i32_1 = arith.constant 0 : i32
    return %c0_i32, %c0_i32_0 : i32, i32
  }
}

module attributes {stable_mosaic.version = 11 : i64} {
  func.func @kernel(%arg0: i32, %arg1: memref<1x8x8x128xbf16, #tpu.memory_space<vmem>>, %arg2: memref<1x128xf32, #tpu.memory_space<vmem>>, %arg3: memref<1x128xf32, #tpu.memory_space<vmem>>, %arg4: memref<3x3x128x128xbf16, #tpu.memory_space<vmem>>, %arg5: memref<1x64x128xbf16, #tpu.memory_space<vmem>>, %arg6: memref<2x128xf32, #tpu.memory_space<vmem>>, %arg7: memref<10x16x128xf32, #tpu.memory_space<vmem>>, %arg8: memref<64x128xf32, #tpu.memory_space<vmem>>) attributes {dimension_semantics = [#tpu.dimension_semantics<arbitrary>], iteration_bounds = array<i64: 2>, scalar_prefetch = 0 : i64, scratch_operands = 2 : i64, tpu.core_type = #tpu.core_type<tc>, window_params = [{transform_indices = @transform_0, window_bounds = array<i64: 1, 8, 8, 128>}, {pipeline_mode = #tpu.pipeline_mode<synchronous>, transform_indices = @transform_1, window_bounds = array<i64: 1, 128>}, {pipeline_mode = #tpu.pipeline_mode<synchronous>, transform_indices = @transform_2, window_bounds = array<i64: 1, 128>}, {pipeline_mode = #tpu.pipeline_mode<synchronous>, transform_indices = @transform_3, window_bounds = array<i64: 3, 3, 128, 128>}, {transform_indices = @transform_4, window_bounds = array<i64: 1, 64, 128>}, {pipeline_mode = #tpu.pipeline_mode<synchronous>, transform_indices = @transform_5, window_bounds = array<i64: 2, 128>}]} {
    %c0_i32 = arith.constant 0 : i32
    %0 = arith.cmpi eq, %arg0, %c0_i32 : i32
    %1 = arith.extui %0 : i1 to i32
    %c0_i32_0 = arith.constant 0 : i32
    %2 = arith.cmpi ne, %1, %c0_i32_0 : i32
    scf.if %2 {
      %cst_126 = arith.constant 0.000000e+00 : f32
      %110 = vector.broadcast %cst_126 : f32 to vector<10x16x128xf32>
      %c0_127 = arith.constant 0 : index
      %c0_128 = arith.constant 0 : index
      %c0_129 = arith.constant 0 : index
      %111 = vector.load %arg7[%c0_127, %c0_128, %c0_129] : memref<10x16x128xf32, #tpu.memory_space<vmem>>, vector<10x16x128xf32>
      tpu.vector_store %arg7[%c0_127, %c0_128, %c0_129], %110 {strides = array<i32>} : memref<10x16x128xf32, #tpu.memory_space<vmem>>, vector<10x16x128xf32>,
      %cst_130 = arith.constant 0.000000e+00 : f32
      %112 = vector.broadcast %cst_130 : f32 to vector<2x128xf32>
      %c0_131 = arith.constant 0 : index
      %c0_132 = arith.constant 0 : index
      %113 = vector.load %arg6[%c0_131, %c0_132] : memref<2x128xf32, #tpu.memory_space<vmem>>, vector<2x128xf32>
      tpu.vector_store %arg6[%c0_131, %c0_132], %112 {strides = array<i32>} : memref<2x128xf32, #tpu.memory_space<vmem>>, vector<2x128xf32>,
    } else {
    }
    %c0 = arith.constant 0 : index
    %c0_1 = arith.constant 0 : index
    %c0_2 = arith.constant 0 : index
    %c0_3 = arith.constant 0 : index
    %3 = vector.load %arg1[%c0, %c0_1, %c0_2, %c0_3] : memref<1x8x8x128xbf16, #tpu.memory_space<vmem>>, vector<1x8x8x128xbf16>
    %4 = vector.shape_cast %3 : vector<1x8x8x128xbf16> to vector<8x8x128xbf16>
    %5 = arith.extf %4 : vector<8x8x128xbf16> to vector<8x8x128xf32>
    %c0_4 = arith.constant 0 : index
    %c0_5 = arith.constant 0 : index
    %6 = vector.load %arg2[%c0_4, %c0_5] : memref<1x128xf32, #tpu.memory_space<vmem>>, vector<1x128xf32>
    %7 = vector.shape_cast %6 : vector<1x128xf32> to vector<1x1x128xf32>
    %8 = vector.broadcast %7 : vector<1x1x128xf32> to vector<8x8x128xf32>
    %9 = arith.mulf %5, %8 : vector<8x8x128xf32>
    %c0_6 = arith.constant 0 : index
    %c0_7 = arith.constant 0 : index
    %10 = vector.load %arg3[%c0_6, %c0_7] : memref<1x128xf32, #tpu.memory_space<vmem>>, vector<1x128xf32>
    %11 = vector.shape_cast %10 : vector<1x128xf32> to vector<1x1x128xf32>
    %12 = vector.broadcast %11 : vector<1x1x128xf32> to vector<8x8x128xf32>
    %13 = arith.addf %9, %12 : vector<8x8x128xf32>
    %cst = arith.constant 0.000000e+00 : f32
    %14 = vector.broadcast %cst : f32 to vector<8x8x128xf32>
    %15 = arith.maximumf %13, %14 : vector<8x8x128xf32>
    %c1 = arith.constant 1 : index
    %c1_8 = arith.constant 1 : index
    %c0_9 = arith.constant 0 : index
    %16 = vector.load %arg7[%c1, %c1_8, %c0_9] : memref<10x16x128xf32, #tpu.memory_space<vmem>>, vector<8x8x128xf32>
    tpu.vector_store %arg7[%c1, %c1_8, %c0_9], %15 {strides = array<i32>} : memref<10x16x128xf32, #tpu.memory_space<vmem>>, vector<8x8x128xf32>,
    %c0_10 = arith.constant 0 : index
    %c0_11 = arith.constant 0 : index
    %c0_12 = arith.constant 0 : index
    %17 = vector.load %arg7[%c0_10, %c0_11, %c0_12] : memref<10x16x128xf32, #tpu.memory_space<vmem>>, vector<8x8x128xf32>
    %18 = arith.truncf %17 : vector<8x8x128xf32> to vector<8x8x128xbf16>
    %19 = vector.shape_cast %18 : vector<8x8x128xbf16> to vector<64x128xbf16>
    %c0_13 = arith.constant 0 : index
    %c0_14 = arith.constant 0 : index
    %c0_15 = arith.constant 0 : index
    %c0_16 = arith.constant 0 : index
    %20 = vector.load %arg4[%c0_13, %c0_14, %c0_15, %c0_16] : memref<3x3x128x128xbf16, #tpu.memory_space<vmem>>, vector<1x1x128x128xbf16>
    %21 = vector.shape_cast %20 : vector<1x1x128x128xbf16> to vector<128x128xbf16>
    %cst_17 = arith.constant dense<0.000000e+00> : vector<64x128xf32>
    %22 = tpu.matmul %19, %21, %cst_17 {dimension_numbers = #tpu.dot_dimension_numbers<[1], [0], [0], [1], [0, 0, 1, 1], [], []>} : vector<64x128xbf16>, vector<128x128xbf16>, vector<64x128xf32> -> vector<64x128xf32>
    %c0_18 = arith.constant 0 : index
    %c0_19 = arith.constant 0 : index
    %23 = vector.load %arg8[%c0_18, %c0_19] : memref<64x128xf32, #tpu.memory_space<vmem>>, vector<64x128xf32>
    tpu.vector_store %arg8[%c0_18, %c0_19], %22 {strides = array<i32>} : memref<64x128xf32, #tpu.memory_space<vmem>>, vector<64x128xf32>,
    %c0_20 = arith.constant 0 : index
    %c1_21 = arith.constant 1 : index
    %c0_22 = arith.constant 0 : index
    %24 = vector.load %arg7[%c0_20, %c1_21, %c0_22] : memref<10x16x128xf32, #tpu.memory_space<vmem>>, vector<8x8x128xf32>
    %25 = arith.truncf %24 : vector<8x8x128xf32> to vector<8x8x128xbf16>
    %26 = vector.shape_cast %25 : vector<8x8x128xbf16> to vector<64x128xbf16>
    %c0_23 = arith.constant 0 : index
    %c1_24 = arith.constant 1 : index
    %c0_25 = arith.constant 0 : index
    %c0_26 = arith.constant 0 : index
    %27 = vector.load %arg4[%c0_23, %c1_24, %c0_25, %c0_26] : memref<3x3x128x128xbf16, #tpu.memory_space<vmem>>, vector<1x1x128x128xbf16>
    %28 = vector.shape_cast %27 : vector<1x1x128x128xbf16> to vector<128x128xbf16>
    %cst_27 = arith.constant dense<0.000000e+00> : vector<64x128xf32>
    %29 = tpu.matmul %26, %28, %cst_27 {dimension_numbers = #tpu.dot_dimension_numbers<[1], [0], [0], [1], [0, 0, 1, 1], [], []>} : vector<64x128xbf16>, vector<128x128xbf16>, vector<64x128xf32> -> vector<64x128xf32>
    %c0_28 = arith.constant 0 : index
    %c0_29 = arith.constant 0 : index
    %30 = vector.load %arg8[%c0_28, %c0_29] : memref<64x128xf32, #tpu.memory_space<vmem>>, vector<64x128xf32>
    %31 = arith.addf %30, %29 : vector<64x128xf32>
    %c0_30 = arith.constant 0 : index
    %c0_31 = arith.constant 0 : index
    %32 = vector.load %arg8[%c0_30, %c0_31] : memref<64x128xf32, #tpu.memory_space<vmem>>, vector<64x128xf32>
    tpu.vector_store %arg8[%c0_30, %c0_31], %31 {strides = array<i32>} : memref<64x128xf32, #tpu.memory_space<vmem>>, vector<64x128xf32>,
    %c0_32 = arith.constant 0 : index
    %c2 = arith.constant 2 : index
    %c0_33 = arith.constant 0 : index
    %33 = vector.load %arg7[%c0_32, %c2, %c0_33] : memref<10x16x128xf32, #tpu.memory_space<vmem>>, vector<8x8x128xf32>
    %34 = arith.truncf %33 : vector<8x8x128xf32> to vector<8x8x128xbf16>
    %35 = vector.shape_cast %34 : vector<8x8x128xbf16> to vector<64x128xbf16>
    %c0_34 = arith.constant 0 : index
    %c2_35 = arith.constant 2 : index
    %c0_36 = arith.constant 0 : index
    %c0_37 = arith.constant 0 : index
    %36 = vector.load %arg4[%c0_34, %c2_35, %c0_36, %c0_37] : memref<3x3x128x128xbf16, #tpu.memory_space<vmem>>, vector<1x1x128x128xbf16>
    %37 = vector.shape_cast %36 : vector<1x1x128x128xbf16> to vector<128x128xbf16>
    %cst_38 = arith.constant dense<0.000000e+00> : vector<64x128xf32>
    %38 = tpu.matmul %35, %37, %cst_38 {dimension_numbers = #tpu.dot_dimension_numbers<[1], [0], [0], [1], [0, 0, 1, 1], [], []>} : vector<64x128xbf16>, vector<128x128xbf16>, vector<64x128xf32> -> vector<64x128xf32>
    %c0_39 = arith.constant 0 : index
    %c0_40 = arith.constant 0 : index
    %39 = vector.load %arg8[%c0_39, %c0_40] : memref<64x128xf32, #tpu.memory_space<vmem>>, vector<64x128xf32>
    %40 = arith.addf %39, %38 : vector<64x128xf32>
    %c0_41 = arith.constant 0 : index
    %c0_42 = arith.constant 0 : index
    %41 = vector.load %arg8[%c0_41, %c0_42] : memref<64x128xf32, #tpu.memory_space<vmem>>, vector<64x128xf32>
    tpu.vector_store %arg8[%c0_41, %c0_42], %40 {strides = array<i32>} : memref<64x128xf32, #tpu.memory_space<vmem>>, vector<64x128xf32>,
    %c1_43 = arith.constant 1 : index
    %c0_44 = arith.constant 0 : index
    %c0_45 = arith.constant 0 : index
    %42 = vector.load %arg7[%c1_43, %c0_44, %c0_45] : memref<10x16x128xf32, #tpu.memory_space<vmem>>, vector<8x8x128xf32>
    %43 = arith.truncf %42 : vector<8x8x128xf32> to vector<8x8x128xbf16>
    %44 = vector.shape_cast %43 : vector<8x8x128xbf16> to vector<64x128xbf16>
    %c1_46 = arith.constant 1 : index
    %c0_47 = arith.constant 0 : index
    %c0_48 = arith.constant 0 : index
    %c0_49 = arith.constant 0 : index
    %45 = vector.load %arg4[%c1_46, %c0_47, %c0_48, %c0_49] : memref<3x3x128x128xbf16, #tpu.memory_space<vmem>>, vector<1x1x128x128xbf16>
    %46 = vector.shape_cast %45 : vector<1x1x128x128xbf16> to vector<128x128xbf16>
    %cst_50 = arith.constant dense<0.000000e+00> : vector<64x128xf32>
    %47 = tpu.matmul %44, %46, %cst_50 {dimension_numbers = #tpu.dot_dimension_numbers<[1], [0], [0], [1], [0, 0, 1, 1], [], []>} : vector<64x128xbf16>, vector<128x128xbf16>, vector<64x128xf32> -> vector<64x128xf32>
    %c0_51 = arith.constant 0 : index
    %c0_52 = arith.constant 0 : index
    %48 = vector.load %arg8[%c0_51, %c0_52] : memref<64x128xf32, #tpu.memory_space<vmem>>, vector<64x128xf32>
    %49 = arith.addf %48, %47 : vector<64x128xf32>
    %c0_53 = arith.constant 0 : index
    %c0_54 = arith.constant 0 : index
    %50 = vector.load %arg8[%c0_53, %c0_54] : memref<64x128xf32, #tpu.memory_space<vmem>>, vector<64x128xf32>
    tpu.vector_store %arg8[%c0_53, %c0_54], %49 {strides = array<i32>} : memref<64x128xf32, #tpu.memory_space<vmem>>, vector<64x128xf32>,
    %c1_55 = arith.constant 1 : index
    %c1_56 = arith.constant 1 : index
    %c0_57 = arith.constant 0 : index
    %51 = vector.load %arg7[%c1_55, %c1_56, %c0_57] : memref<10x16x128xf32, #tpu.memory_space<vmem>>, vector<8x8x128xf32>
    %52 = arith.truncf %51 : vector<8x8x128xf32> to vector<8x8x128xbf16>
    %53 = vector.shape_cast %52 : vector<8x8x128xbf16> to vector<64x128xbf16>
    %c1_58 = arith.constant 1 : index
    %c1_59 = arith.constant 1 : index
    %c0_60 = arith.constant 0 : index
    %c0_61 = arith.constant 0 : index
    %54 = vector.load %arg4[%c1_58, %c1_59, %c0_60, %c0_61] : memref<3x3x128x128xbf16, #tpu.memory_space<vmem>>, vector<1x1x128x128xbf16>
    %55 = vector.shape_cast %54 : vector<1x1x128x128xbf16> to vector<128x128xbf16>
    %cst_62 = arith.constant dense<0.000000e+00> : vector<64x128xf32>
    %56 = tpu.matmul %53, %55, %cst_62 {dimension_numbers = #tpu.dot_dimension_numbers<[1], [0], [0], [1], [0, 0, 1, 1], [], []>} : vector<64x128xbf16>, vector<128x128xbf16>, vector<64x128xf32> -> vector<64x128xf32>
    %c0_63 = arith.constant 0 : index
    %c0_64 = arith.constant 0 : index
    %57 = vector.load %arg8[%c0_63, %c0_64] : memref<64x128xf32, #tpu.memory_space<vmem>>, vector<64x128xf32>
    %58 = arith.addf %57, %56 : vector<64x128xf32>
    %c0_65 = arith.constant 0 : index
    %c0_66 = arith.constant 0 : index
    %59 = vector.load %arg8[%c0_65, %c0_66] : memref<64x128xf32, #tpu.memory_space<vmem>>, vector<64x128xf32>
    tpu.vector_store %arg8[%c0_65, %c0_66], %58 {strides = array<i32>} : memref<64x128xf32, #tpu.memory_space<vmem>>, vector<64x128xf32>,
    %c1_67 = arith.constant 1 : index
    %c2_68 = arith.constant 2 : index
    %c0_69 = arith.constant 0 : index
    %60 = vector.load %arg7[%c1_67, %c2_68, %c0_69] : memref<10x16x128xf32, #tpu.memory_space<vmem>>, vector<8x8x128xf32>
    %61 = arith.truncf %60 : vector<8x8x128xf32> to vector<8x8x128xbf16>
    %62 = vector.shape_cast %61 : vector<8x8x128xbf16> to vector<64x128xbf16>
    %c1_70 = arith.constant 1 : index
    %c2_71 = arith.constant 2 : index
    %c0_72 = arith.constant 0 : index
    %c0_73 = arith.constant 0 : index
    %63 = vector.load %arg4[%c1_70, %c2_71, %c0_72, %c0_73] : memref<3x3x128x128xbf16, #tpu.memory_space<vmem>>, vector<1x1x128x128xbf16>
    %64 = vector.shape_cast %63 : vector<1x1x128x128xbf16> to vector<128x128xbf16>
    %cst_74 = arith.constant dense<0.000000e+00> : vector<64x128xf32>
    %65 = tpu.matmul %62, %64, %cst_74 {dimension_numbers = #tpu.dot_dimension_numbers<[1], [0], [0], [1], [0, 0, 1, 1], [], []>} : vector<64x128xbf16>, vector<128x128xbf16>, vector<64x128xf32> -> vector<64x128xf32>
    %c0_75 = arith.constant 0 : index
    %c0_76 = arith.constant 0 : index
    %66 = vector.load %arg8[%c0_75, %c0_76] : memref<64x128xf32, #tpu.memory_space<vmem>>, vector<64x128xf32>
    %67 = arith.addf %66, %65 : vector<64x128xf32>
    %c0_77 = arith.constant 0 : index
    %c0_78 = arith.constant 0 : index
    %68 = vector.load %arg8[%c0_77, %c0_78] : memref<64x128xf32, #tpu.memory_space<vmem>>, vector<64x128xf32>
    tpu.vector_store %arg8[%c0_77, %c0_78], %67 {strides = array<i32>} : memref<64x128xf32, #tpu.memory_space<vmem>>, vector<64x128xf32>,
    %c2_79 = arith.constant 2 : index
    %c0_80 = arith.constant 0 : index
    %c0_81 = arith.constant 0 : index
    %69 = vector.load %arg7[%c2_79, %c0_80, %c0_81] : memref<10x16x128xf32, #tpu.memory_space<vmem>>, vector<8x8x128xf32>
    %70 = arith.truncf %69 : vector<8x8x128xf32> to vector<8x8x128xbf16>
    %71 = vector.shape_cast %70 : vector<8x8x128xbf16> to vector<64x128xbf16>
    %c2_82 = arith.constant 2 : index
    %c0_83 = arith.constant 0 : index
    %c0_84 = arith.constant 0 : index
    %c0_85 = arith.constant 0 : index
    %72 = vector.load %arg4[%c2_82, %c0_83, %c0_84, %c0_85] : memref<3x3x128x128xbf16, #tpu.memory_space<vmem>>, vector<1x1x128x128xbf16>
    %73 = vector.shape_cast %72 : vector<1x1x128x128xbf16> to vector<128x128xbf16>
    %cst_86 = arith.constant dense<0.000000e+00> : vector<64x128xf32>
    %74 = tpu.matmul %71, %73, %cst_86 {dimension_numbers = #tpu.dot_dimension_numbers<[1], [0], [0], [1], [0, 0, 1, 1], [], []>} : vector<64x128xbf16>, vector<128x128xbf16>, vector<64x128xf32> -> vector<64x128xf32>
    %c0_87 = arith.constant 0 : index
    %c0_88 = arith.constant 0 : index
    %75 = vector.load %arg8[%c0_87, %c0_88] : memref<64x128xf32, #tpu.memory_space<vmem>>, vector<64x128xf32>
    %76 = arith.addf %75, %74 : vector<64x128xf32>
    %c0_89 = arith.constant 0 : index
    %c0_90 = arith.constant 0 : index
    %77 = vector.load %arg8[%c0_89, %c0_90] : memref<64x128xf32, #tpu.memory_space<vmem>>, vector<64x128xf32>
    tpu.vector_store %arg8[%c0_89, %c0_90], %76 {strides = array<i32>} : memref<64x128xf32, #tpu.memory_space<vmem>>, vector<64x128xf32>,
    %c2_91 = arith.constant 2 : index
    %c1_92 = arith.constant 1 : index
    %c0_93 = arith.constant 0 : index
    %78 = vector.load %arg7[%c2_91, %c1_92, %c0_93] : memref<10x16x128xf32, #tpu.memory_space<vmem>>, vector<8x8x128xf32>
    %79 = arith.truncf %78 : vector<8x8x128xf32> to vector<8x8x128xbf16>
    %80 = vector.shape_cast %79 : vector<8x8x128xbf16> to vector<64x128xbf16>
    %c2_94 = arith.constant 2 : index
    %c1_95 = arith.constant 1 : index
    %c0_96 = arith.constant 0 : index
    %c0_97 = arith.constant 0 : index
    %81 = vector.load %arg4[%c2_94, %c1_95, %c0_96, %c0_97] : memref<3x3x128x128xbf16, #tpu.memory_space<vmem>>, vector<1x1x128x128xbf16>
    %82 = vector.shape_cast %81 : vector<1x1x128x128xbf16> to vector<128x128xbf16>
    %cst_98 = arith.constant dense<0.000000e+00> : vector<64x128xf32>
    %83 = tpu.matmul %80, %82, %cst_98 {dimension_numbers = #tpu.dot_dimension_numbers<[1], [0], [0], [1], [0, 0, 1, 1], [], []>} : vector<64x128xbf16>, vector<128x128xbf16>, vector<64x128xf32> -> vector<64x128xf32>
    %c0_99 = arith.constant 0 : index
    %c0_100 = arith.constant 0 : index
    %84 = vector.load %arg8[%c0_99, %c0_100] : memref<64x128xf32, #tpu.memory_space<vmem>>, vector<64x128xf32>
    %85 = arith.addf %84, %83 : vector<64x128xf32>
    %c0_101 = arith.constant 0 : index
    %c0_102 = arith.constant 0 : index
    %86 = vector.load %arg8[%c0_101, %c0_102] : memref<64x128xf32, #tpu.memory_space<vmem>>, vector<64x128xf32>
    tpu.vector_store %arg8[%c0_101, %c0_102], %85 {strides = array<i32>} : memref<64x128xf32, #tpu.memory_space<vmem>>, vector<64x128xf32>,
    %c2_103 = arith.constant 2 : index
    %c2_104 = arith.constant 2 : index
    %c0_105 = arith.constant 0 : index
    %87 = vector.load %arg7[%c2_103, %c2_104, %c0_105] : memref<10x16x128xf32, #tpu.memory_space<vmem>>, vector<8x8x128xf32>
    %88 = arith.truncf %87 : vector<8x8x128xf32> to vector<8x8x128xbf16>
    %89 = vector.shape_cast %88 : vector<8x8x128xbf16> to vector<64x128xbf16>
    %c2_106 = arith.constant 2 : index
    %c2_107 = arith.constant 2 : index
    %c0_108 = arith.constant 0 : index
    %c0_109 = arith.constant 0 : index
    %90 = vector.load %arg4[%c2_106, %c2_107, %c0_108, %c0_109] : memref<3x3x128x128xbf16, #tpu.memory_space<vmem>>, vector<1x1x128x128xbf16>
    %91 = vector.shape_cast %90 : vector<1x1x128x128xbf16> to vector<128x128xbf16>
    %cst_110 = arith.constant dense<0.000000e+00> : vector<64x128xf32>
    %92 = tpu.matmul %89, %91, %cst_110 {dimension_numbers = #tpu.dot_dimension_numbers<[1], [0], [0], [1], [0, 0, 1, 1], [], []>} : vector<64x128xbf16>, vector<128x128xbf16>, vector<64x128xf32> -> vector<64x128xf32>
    %c0_111 = arith.constant 0 : index
    %c0_112 = arith.constant 0 : index
    %93 = vector.load %arg8[%c0_111, %c0_112] : memref<64x128xf32, #tpu.memory_space<vmem>>, vector<64x128xf32>
    %94 = arith.addf %93, %92 : vector<64x128xf32>
    %c0_113 = arith.constant 0 : index
    %c0_114 = arith.constant 0 : index
    %95 = vector.load %arg8[%c0_113, %c0_114] : memref<64x128xf32, #tpu.memory_space<vmem>>, vector<64x128xf32>
    tpu.vector_store %arg8[%c0_113, %c0_114], %94 {strides = array<i32>} : memref<64x128xf32, #tpu.memory_space<vmem>>, vector<64x128xf32>,
    %c0_115 = arith.constant 0 : index
    %c0_116 = arith.constant 0 : index
    %96 = vector.load %arg8[%c0_115, %c0_116] : memref<64x128xf32, #tpu.memory_space<vmem>>, vector<64x128xf32>
    %97 = arith.truncf %96 : vector<64x128xf32> to vector<64x128xbf16>
    %c0_117 = arith.constant 0 : index
    %c0_118 = arith.constant 0 : index
    %c0_119 = arith.constant 0 : index
    %98 = vector.load %arg5[%c0_117, %c0_118, %c0_119] : memref<1x64x128xbf16, #tpu.memory_space<vmem>>, vector<1x64x128xbf16>
    %99 = vector.shape_cast %98 : vector<1x64x128xbf16> to vector<64x128xbf16>
    %100 = vector.shape_cast %97 : vector<64x128xbf16> to vector<1x64x128xbf16>
    tpu.vector_store %arg5[%c0_117, %c0_118, %c0_119], %100 {strides = array<i32>} : memref<1x64x128xbf16, #tpu.memory_space<vmem>>, vector<1x64x128xbf16>,
    %c0_120 = arith.constant 0 : index
    %c0_121 = arith.constant 0 : index
    %101 = vector.load %arg6[%c0_120, %c0_121] : memref<2x128xf32, #tpu.memory_space<vmem>>, vector<2x128xf32>
    %cst_122 = arith.constant dense<0.000000e+00> : vector<128xf32>
    %102 = vector.multi_reduction <add>, %96, %cst_122 [0] : vector<64x128xf32> to vector<128xf32>
    %103 = vector.shape_cast %102 : vector<128xf32> to vector<1x128xf32>
    %104 = arith.mulf %96, %96 : vector<64x128xf32>
    %cst_123 = arith.constant dense<0.000000e+00> : vector<128xf32>
    %105 = vector.multi_reduction <add>, %104, %cst_123 [0] : vector<64x128xf32> to vector<128xf32>
    %106 = vector.shape_cast %105 : vector<128xf32> to vector<1x128xf32>
    %107 = tpu.concatenate %103, %106 in 0 : vector<1x128xf32>, vector<1x128xf32> -> vector<2x128xf32>
    %108 = arith.addf %101, %107 : vector<2x128xf32>
    %c0_124 = arith.constant 0 : index
    %c0_125 = arith.constant 0 : index
    %109 = vector.load %arg6[%c0_124, %c0_125] : memref<2x128xf32, #tpu.memory_space<vmem>>, vector<2x128xf32>
    tpu.vector_store %arg6[%c0_124, %c0_125], %108 {strides = array<i32>} : memref<2x128xf32, #tpu.memory_space<vmem>>, vector<2x128xf32>,
    return
  }
  func.func @transform_0(%arg0: i32) -> (i32, i32, i32, i32) {
    %c0_i32 = arith.constant 0 : i32
    %c0_i32_0 = arith.constant 0 : i32
    %c0_i32_1 = arith.constant 0 : i32
    %c0_i32_2 = arith.constant 0 : i32
    return %arg0, %c0_i32, %c0_i32_0, %c0_i32_1 : i32, i32, i32, i32
  }
  func.func @transform_1(%arg0: i32) -> (i32, i32) {
    %c0_i32 = arith.constant 0 : i32
    %c0_i32_0 = arith.constant 0 : i32
    %c0_i32_1 = arith.constant 0 : i32
    return %c0_i32, %c0_i32_0 : i32, i32
  }
  func.func @transform_2(%arg0: i32) -> (i32, i32) {
    %c0_i32 = arith.constant 0 : i32
    %c0_i32_0 = arith.constant 0 : i32
    %c0_i32_1 = arith.constant 0 : i32
    return %c0_i32, %c0_i32_0 : i32, i32
  }
  func.func @transform_3(%arg0: i32) -> (i32, i32, i32, i32) {
    %c0_i32 = arith.constant 0 : i32
    %c0_i32_0 = arith.constant 0 : i32
    %c0_i32_1 = arith.constant 0 : i32
    %c0_i32_2 = arith.constant 0 : i32
    %c0_i32_3 = arith.constant 0 : i32
    return %c0_i32, %c0_i32_0, %c0_i32_1, %c0_i32_2 : i32, i32, i32, i32
  }
  func.func @transform_4(%arg0: i32) -> (i32, i32, i32) {
    %c0_i32 = arith.constant 0 : i32
    %c0_i32_0 = arith.constant 0 : i32
    %c0_i32_1 = arith.constant 0 : i32
    return %arg0, %c0_i32, %c0_i32_0 : i32, i32, i32
  }
  func.func @transform_5(%arg0: i32) -> (i32, i32) {
    %c0_i32 = arith.constant 0 : i32
    %c0_i32_0 = arith.constant 0 : i32
    %c0_i32_1 = arith.constant 0 : i32
    return %c0_i32, %c0_i32_0 : i32, i32
  }
}

module attributes {stable_mosaic.version = 11 : i64} {
  func.func @_bn_add_relu_kernel(%arg0: i32, %arg1: i32, %arg2: memref<1x64x128xbf16, #tpu.memory_space<vmem>>, %arg3: memref<1x64x4xbf16, #tpu.memory_space<vmem>>, %arg4: memref<4x128xbf16, #tpu.memory_space<vmem>>, %arg5: memref<1x128xf32, #tpu.memory_space<vmem>>, %arg6: memref<1x128xf32, #tpu.memory_space<vmem>>, %arg7: memref<1x128xf32, #tpu.memory_space<vmem>>, %arg8: memref<1x128xf32, #tpu.memory_space<vmem>>, %arg9: memref<1x64x128xf32, #tpu.memory_space<vmem>>) attributes {dimension_semantics = [#tpu.dimension_semantics<parallel>, #tpu.dimension_semantics<parallel>], iteration_bounds = array<i64: 2, 1>, scalar_prefetch = 0 : i64, scratch_operands = 0 : i64, tpu.core_type = #tpu.core_type<tc>, window_params = [{transform_indices = @transform_0, window_bounds = array<i64: 1, 64, 128>}, {transform_indices = @transform_1, window_bounds = array<i64: 1, 64, 4>}, {pipeline_mode = #tpu.pipeline_mode<synchronous>, transform_indices = @transform_2, window_bounds = array<i64: 4, 128>}, {pipeline_mode = #tpu.pipeline_mode<synchronous>, transform_indices = @transform_3, window_bounds = array<i64: 1, 128>}, {pipeline_mode = #tpu.pipeline_mode<synchronous>, transform_indices = @transform_4, window_bounds = array<i64: 1, 128>}, {pipeline_mode = #tpu.pipeline_mode<synchronous>, transform_indices = @transform_5, window_bounds = array<i64: 1, 128>}, {pipeline_mode = #tpu.pipeline_mode<synchronous>, transform_indices = @transform_6, window_bounds = array<i64: 1, 128>}, {transform_indices = @transform_7, window_bounds = array<i64: 1, 64, 128>}]} {
    %c0 = arith.constant 0 : index
    %c0_0 = arith.constant 0 : index
    %c0_1 = arith.constant 0 : index
    %0 = vector.load %arg3[%c0, %c0_0, %c0_1] : memref<1x64x4xbf16, #tpu.memory_space<vmem>>, vector<1x64x4xbf16>
    %1 = vector.shape_cast %0 : vector<1x64x4xbf16> to vector<64x4xbf16>
    %c0_2 = arith.constant 0 : index
    %c0_3 = arith.constant 0 : index
    %2 = vector.load %arg4[%c0_2, %c0_3] : memref<4x128xbf16, #tpu.memory_space<vmem>>, vector<4x128xbf16>
    %cst = arith.constant dense<0.000000e+00> : vector<64x128xf32>
    %3 = tpu.matmul %1, %2, %cst {dimension_numbers = #tpu.dot_dimension_numbers<[1], [0], [0], [1], [0, 0, 1, 1], [], []>} : vector<64x4xbf16>, vector<4x128xbf16>, vector<64x128xf32> -> vector<64x128xf32>
    %c0_4 = arith.constant 0 : index
    %c0_5 = arith.constant 0 : index
    %c0_6 = arith.constant 0 : index
    %4 = vector.load %arg2[%c0_4, %c0_5, %c0_6] : memref<1x64x128xbf16, #tpu.memory_space<vmem>>, vector<1x64x128xbf16>
    %5 = vector.shape_cast %4 : vector<1x64x128xbf16> to vector<64x128xbf16>
    %6 = arith.extf %5 : vector<64x128xbf16> to vector<64x128xf32>
    %c0_7 = arith.constant 0 : index
    %c0_8 = arith.constant 0 : index
    %7 = vector.load %arg5[%c0_7, %c0_8] : memref<1x128xf32, #tpu.memory_space<vmem>>, vector<1x128xf32>
    %8 = vector.broadcast %7 : vector<1x128xf32> to vector<64x128xf32>
    %9 = arith.mulf %6, %8 : vector<64x128xf32>
    %c0_9 = arith.constant 0 : index
    %c0_10 = arith.constant 0 : index
    %10 = vector.load %arg6[%c0_9, %c0_10] : memref<1x128xf32, #tpu.memory_space<vmem>>, vector<1x128xf32>
    %11 = vector.broadcast %10 : vector<1x128xf32> to vector<64x128xf32>
    %12 = arith.addf %9, %11 : vector<64x128xf32>
    %c0_11 = arith.constant 0 : index
    %c0_12 = arith.constant 0 : index
    %13 = vector.load %arg7[%c0_11, %c0_12] : memref<1x128xf32, #tpu.memory_space<vmem>>, vector<1x128xf32>
    %14 = vector.broadcast %13 : vector<1x128xf32> to vector<64x128xf32>
    %15 = arith.mulf %3, %14 : vector<64x128xf32>
    %16 = arith.addf %12, %15 : vector<64x128xf32>
    %c0_13 = arith.constant 0 : index
    %c0_14 = arith.constant 0 : index
    %17 = vector.load %arg8[%c0_13, %c0_14] : memref<1x128xf32, #tpu.memory_space<vmem>>, vector<1x128xf32>
    %18 = vector.broadcast %17 : vector<1x128xf32> to vector<64x128xf32>
    %19 = arith.addf %16, %18 : vector<64x128xf32>
    %cst_15 = arith.constant 0.000000e+00 : f32
    %20 = vector.broadcast %cst_15 : f32 to vector<64x128xf32>
    %21 = arith.maximumf %19, %20 : vector<64x128xf32>
    %c0_16 = arith.constant 0 : index
    %c0_17 = arith.constant 0 : index
    %c0_18 = arith.constant 0 : index
    %22 = vector.load %arg9[%c0_16, %c0_17, %c0_18] : memref<1x64x128xf32, #tpu.memory_space<vmem>>, vector<1x64x128xf32>
    %23 = vector.shape_cast %22 : vector<1x64x128xf32> to vector<64x128xf32>
    %24 = vector.shape_cast %21 : vector<64x128xf32> to vector<1x64x128xf32>
    tpu.vector_store %arg9[%c0_16, %c0_17, %c0_18], %24 {strides = array<i32>} : memref<1x64x128xf32, #tpu.memory_space<vmem>>, vector<1x64x128xf32>,
    return
  }
  func.func @transform_0(%arg0: i32, %arg1: i32) -> (i32, i32, i32) {
    %c0_i32 = arith.constant 0 : i32
    %c0_i32_0 = arith.constant 0 : i32
    return %arg0, %arg1, %c0_i32 : i32, i32, i32
  }
  func.func @transform_1(%arg0: i32, %arg1: i32) -> (i32, i32, i32) {
    %c0_i32 = arith.constant 0 : i32
    %c0_i32_0 = arith.constant 0 : i32
    return %arg0, %arg1, %c0_i32 : i32, i32, i32
  }
  func.func @transform_2(%arg0: i32, %arg1: i32) -> (i32, i32) {
    %c0_i32 = arith.constant 0 : i32
    %c0_i32_0 = arith.constant 0 : i32
    %c0_i32_1 = arith.constant 0 : i32
    return %c0_i32, %c0_i32_0 : i32, i32
  }
  func.func @transform_3(%arg0: i32, %arg1: i32) -> (i32, i32) {
    %c0_i32 = arith.constant 0 : i32
    %c0_i32_0 = arith.constant 0 : i32
    %c0_i32_1 = arith.constant 0 : i32
    return %c0_i32, %c0_i32_0 : i32, i32
  }
  func.func @transform_4(%arg0: i32, %arg1: i32) -> (i32, i32) {
    %c0_i32 = arith.constant 0 : i32
    %c0_i32_0 = arith.constant 0 : i32
    %c0_i32_1 = arith.constant 0 : i32
    return %c0_i32, %c0_i32_0 : i32, i32
  }
  func.func @transform_5(%arg0: i32, %arg1: i32) -> (i32, i32) {
    %c0_i32 = arith.constant 0 : i32
    %c0_i32_0 = arith.constant 0 : i32
    %c0_i32_1 = arith.constant 0 : i32
    return %c0_i32, %c0_i32_0 : i32, i32
  }
  func.func @transform_6(%arg0: i32, %arg1: i32) -> (i32, i32) {
    %c0_i32 = arith.constant 0 : i32
    %c0_i32_0 = arith.constant 0 : i32
    %c0_i32_1 = arith.constant 0 : i32
    return %c0_i32, %c0_i32_0 : i32, i32
  }
  func.func @transform_7(%arg0: i32, %arg1: i32) -> (i32, i32, i32) {
    %c0_i32 = arith.constant 0 : i32
    %c0_i32_0 = arith.constant 0 : i32
    return %arg0, %arg1, %c0_i32 : i32, i32, i32
  }
}

</mosaic_0001>

<bundles_post_ra>
// kernel: _lambda_.3
= control target key start
LH: loop header
LB: loop body
LE: loop exit
PB: predicated region body
PF: predicated region fallthrough
CT: control target
= control target key end

     0   :  { %s735_s12 = smov 0   ;;  %s737_s13 = smov 0   ;;  %s806_s0 = inlined_call_operand.vmem [shape: bf16[2,64,36], index: 0, kind: input, shape index: {}]   ;;  %s807_s1 = inlined_call_operand.vmem [shape: bf16[36,256], index: 1, kind: input, shape index: {}]   ;;  %s808_s2 = inlined_call_operand.vmem [shape: bf16[2,64,128], index: 2, kind: output, shape index: {0}]   ;;  %s809_s3 = inlined_call_operand.vmem [shape: f32[4,128], index: 3, kind: output, shape index: {1}]  }
   0x1   :  { %s739_s14 = smov 0  }
   0x2 LB: > { %s26_s15 = sadd.s32 1, %s707_s13  ;;  %p580_p0 = scmp.ge.s32.totalorder %s711_s14, 1  ;;  %s711_s14 = sphi %s739_s14, %s14_s14   ;;  %s707_s13 = sphi %s737_s13, %s811_s13   ;;  %s703_s12 = sphi %s735_s12, %s810_s12  }
   0x3   : > { %p28_p1 = scmp.ge.s32.totalorder %s26_s15, 2  ;;  %p156_p2 = scmp.lt.s32.totalorder %s711_s14, 3 }
   0x5   : > { %s813_s15 = smov (%p28_p1, %s26_s15), 0  ;;  %p157_p3 = pnand %p580_p0, %p156_p2 }
   0x6   : > { %p189_p4 = scmp.lt.s32.totalorder (!%p157_p3), %s703_s12, 1  ;;  %p400_p5 = scmp.eq.s32.totalorder (!%p157_p3), %s703_s12, 0 }
   0x7   : > { %160 = sbr.rel (%p157_p3) target bundleno = 269 (0x10d), region = 28 }
   0xc   : > { %v221_v0 = vld [vmem:[%s807_s1 + $0x20] sm:$0x33]  ;;  %vm280_vm0 = vcmask 1041408   ;;  %v679_v3 = vld [vmem:[%s807_s1 + $0x14] ss:$8 sps:$4 sm:$0xff]   ;;  %v713_v4 = vmov 0  }
   0xd   : > { %v594_v1 = vcombine.high %v221_v0, %v221_v0  ;;  %v593_v2 = vcombine.low %v221_v0, %v221_v0  ;;  %319 = vmatprep.mubr.bf16.mxu0 %v713_v4  ;;  %339 = vmatprep.mubr.bf16.mxu1 %v713_v4  ;;  %s766_s20 = scalar_select %p189_p4, %s703_s12, 1  ;;  %v681_v6 = vld [vmem:[%s807_s1 + $0x10] ss:$8 sps:$4 sm:$0xff]   ;;  %v682_v7 = vld [vmem:[%s807_s1 + $0x4] ss:$8 sps:$4 sm:$0xff]   ;;  %vm267_vm1 = vcmask 293888  }
   0xe   : > { %v684_v8 = vld [vmem:[%s807_s1] ss:$8 sps:$4 sm:$0xff]   ;;  %v714_v33 = vmov (%p400_p5), 0.0  }
   0xf   : > { %595 = vmatprep.subr.msk.bf16.mxu0 %vm280_vm0, %v594_v1  ;;  %645 = vmatprep.subr.msk.bf16.mxu1 %vm280_vm0, %v594_v1  ;;  %v282_v5 = vsel %vm280_vm0, %v593_v2, 0  ;;  %s611_s25 = sshll.u32 %s766_s20, 5  ;;  %406 = vst [vmem:[%s809_s3] sm:$0xf] (%p400_p5), %v714_v33 }
  0x10   : > { %298 = vmatpush1.bf16.msra.mxu0 %v282_v5  ;;  %648 = vmatpush1.bf16.msra.mxu1 %v282_v5  ;;  %s196_s28 = scalar_lea.vmem %s806_s0, %s611_s25  ;;  %s206_s6 = scalar_lea.vmem %s808_s2, %s611_s25 }
  0x11   : > { %299 = vmatprep.subr.bf16.mxu0 %v679_v3  ;;  %646 = vmatprep.subr.bf16.mxu1 %v679_v3  ;;  %v685_v9 = vld [vmem:[%s196_s28] sm:$0xff]   ;;  %v686_v10 = vld [vmem:[%s196_s28 + $0x10] sm:$0xff]   ;;  %v687_v11 = vld [vmem:[%s196_s28 + $0x8] sm:$0xff]  }
  0x12   : > { %v688_v12 = vld [vmem:[%s196_s28 + $0x18] sm:$0xff]  }
  0x14   : > { %300 = vmatpush1.bf16.msra.mxu0 %v681_v6  ;;  %649 = vmatpush1.bf16.msra.mxu1 %v681_v6 }
  0x15   : > { %301 = vmatprep.subr.bf16.mxu0 %v682_v7  ;;  %647 = vmatprep.subr.bf16.mxu1 %v682_v7 }
  0x18   : > { %302 = vmatpush1.bf16.msra.mxu0 %v684_v8  ;;  %650 = vmatpush1.bf16.msra.mxu1 %v684_v8 }
  0x1b   : > { %596 = vmatmul.mubr.msk.bf16.vlgmr.msra.gmra.mxu0 %vm267_vm1, %v685_v9  ;;  %598 = vmatmul.mubr.msk.bf16.vlgmr.msra.gmra.mxu1 %vm267_vm1, %v686_v10 }
  0x1c   : > { %329 = vmatprep.mubr.bf16.mxu0 %v713_v4  ;;  %349 = vmatprep.mubr.bf16.mxu1 %v713_v4 }
  0x23   : > { %597 = vmatmul.mubr.msk.bf16.gmra.mxu0 %vm267_vm1, %v687_v11  ;;  %599 = vmatmul.mubr.msk.bf16.gmra.mxu1 %vm267_vm1, %v688_v12 }
  0xdb   : > { %v321_v13 = vpop.f32.mrf.mxu0  ;;  %v341_v14 = vpop.f32.mrf.mxu1 }
  0xdd   : > { %v323_v15 = vpop.f32.mrf.mxu0  ;;  %v343_v16 = vpop.f32.mrf.mxu1 }
  0xdf   : > { %v325_v17 = vpop.f32.mrf.mxu0  ;;  %v345_v18 = vpop.f32.mrf.mxu1 }
  0xe0   : > { %v625_v19 = vpack.c.bf16 %v325_v17, %v321_v13  ;;  %v635_v20 = vpack.c.bf16 %v345_v18, %v341_v14 }
  0xe1   : > { %v327_v21 = vpop.f32.mrf.mxu0  ;;  %v347_v22 = vpop.f32.mrf.mxu1 }
  0xe2   : > { %626 = vst [vmem:[%s206_s6] sm:$0xff] %v625_v19   ;;  %643 = vst [vmem:[%s206_s6 + $0x10] sm:$0xff] %v635_v20  }
  0xe3   : > { %v331_v23 = vpop.f32.mrf.mxu0  ;;  %v351_v24 = vpop.f32.mrf.mxu1 }
  0xe5   : > { %v333_v25 = vpop.f32.mrf.mxu0  ;;  %v353_v26 = vpop.f32.mrf.mxu1 }
  0xe6   : > { %405 = sbr.rel (!%p400_p5) target bundleno = 235 (0xeb), region = 32 }
  0xe7   : > { %v335_v27 = vpop.f32.mrf.mxu0  ;;  %v355_v28 = vpop.f32.mrf.mxu1 }
  0xe8   : > { %v630_v29 = vpack.c.bf16 %v335_v27, %v331_v23  ;;  %v640_v30 = vpack.c.bf16 %v355_v28, %v351_v24 }
  0xe9   : > { %v337_v31 = vpop.f32.mrf.mxu0  ;;  %v357_v32 = vpop.f32.mrf.mxu1 }
  0xea   : > { %642 = vst [vmem:[%s206_s6 + $0x8] sm:$0xff] %v630_v29   ;;  %644 = vst [vmem:[%s206_s6 + $0x18] sm:$0xff] %v640_v30  }
  0xeb PF: > { %v408_v34 = vadd.f32 %v325_v17, %v321_v13  ;;  %v421_v35 = vmul.f32 %v321_v13, %v321_v13  ;;  %v422_v36 = vmul.f32 %v325_v17, %v325_v17  ;;  %v423_v37 = vmul.f32 %v331_v23, %v331_v23 }
  0xec   : > { %v424_v39 = vmul.f32 %v335_v27, %v335_v27  ;;  %v442_v41 = vadd.f32 %v327_v21, %v323_v15  ;;  %v455_v42 = vmul.f32 %v323_v15, %v323_v15  ;;  %v456_v43 = vmul.f32 %v327_v21, %v327_v21 }
  0xed   : > { %v409_v38 = vadd.f32 %v408_v34, %v331_v23  ;;  %v429_v40 = vadd.f32 %v422_v36, %v421_v35  ;;  %v457_v44 = vmul.f32 %v333_v25, %v333_v25  ;;  %v425_v46 = vmul.f32 %v341_v14, %v341_v14 }
  0xee   : > { %v443_v48 = vadd.f32 %v442_v41, %v333_v25  ;;  %v458_v49 = vmul.f32 %v337_v31, %v337_v31  ;;  %v463_v50 = vadd.f32 %v456_v43, %v455_v42  ;;  %v426_v52 = vmul.f32 %v345_v18, %v345_v18 }
  0xef   : > { %v410_v45 = vadd.f32 %v409_v38, %v335_v27  ;;  %v430_v47 = vadd.f32 %v429_v40, %v423_v37  ;;  %v459_v55 = vmul.f32 %v343_v16, %v343_v16  ;;  %v427_v58 = vmul.f32 %v351_v24, %v351_v24  ;;  %v407_v38 = vld [vmem:[%s809_s3] sm:$0xf] }
  0xf0   : > { %v444_v54 = vadd.f32 %v443_v48, %v337_v31  ;;  %v464_v56 = vadd.f32 %v463_v50, %v457_v44  ;;  %v460_v61 = vmul.f32 %v347_v22, %v347_v22  ;;  %v428_v0 = vmul.f32 %v355_v28, %v355_v28 }
  0xf1   : > { %v411_v51 = vadd.f32 %v410_v45, %v341_v14  ;;  %v431_v53 = vadd.f32 %v430_v47, %v424_v39  ;;  %v461_v3 = vmul.f32 %v353_v26, %v353_v26  ;;  %v462_v8 = vmul.f32 %v357_v32, %v357_v32 }
  0xf2   : > { %v445_v60 = vadd.f32 %v444_v54, %v343_v16  ;;  %v465_v62 = vadd.f32 %v464_v56, %v458_v49  ;;  %vm476_vm2 = vcmask 1040384   ;;  %vm479_vm3 = vcmask 1042432  }
  0xf3   : > { %v412_v57 = vadd.f32 %v411_v51, %v345_v18  ;;  %v432_v59 = vadd.f32 %v431_v53, %v425_v46 }
  0xf4   : > { %v446_v2 = vadd.f32 %v445_v60, %v347_v22  ;;  %v466_v4 = vadd.f32 %v465_v62, %v459_v55 }
  0xf5   : > { %v413_v63 = vadd.f32 %v412_v57, %v351_v24  ;;  %v433_v1 = vadd.f32 %v432_v59, %v426_v52 }
  0xf6   : > { %v447_v7 = vadd.f32 %v446_v2, %v353_v26  ;;  %v467_v9 = vadd.f32 %v466_v4, %v460_v61 }
  0xf7   : > { %v414_v5 = vadd.f32 %v413_v63, %v355_v28  ;;  %v434_v6 = vadd.f32 %v433_v1, %v427_v58 }
  0xf8   : > { %v448_v12 = vadd.f32 %v447_v7, %v357_v32  ;;  %v468_v13 = vadd.f32 %v467_v9, %v461_v3 }
  0xf9   : > { %v415_v10 = vrot.slane %v414_v5, 4  ;;  %v435_v11 = vadd.f32 %v434_v6, %v428_v0 }
  0xfa   : > { %v449_v16 = vrot.slane %v448_v12, 4  ;;  %v469_v17 = vadd.f32 %v468_v13, %v462_v8 }
  0xfb   : > { %v416_v14 = vadd.f32 %v415_v10, %v414_v5  ;;  %v436_v15 = vrot.slane %v435_v11, 4 }
  0xfc   : > { %v450_v20 = vadd.f32 %v449_v16, %v448_v12  ;;  %v470_v21 = vrot.slane %v469_v17, 4 }
  0xfd   : > { %v417_v18 = vrot.slane %v416_v14, 2  ;;  %v437_v19 = vadd.f32 %v436_v15, %v435_v11 }
  0xfe   : > { %v451_v24 = vrot.slane %v450_v20, 2  ;;  %v471_v25 = vadd.f32 %v470_v21, %v469_v17 }
  0xff   : > { %v418_v22 = vadd.f32 %v417_v18, %v416_v14  ;;  %v438_v23 = vrot.slane %v437_v19, 2 }
 0x100   : > { %v452_v28 = vadd.f32 %v451_v24, %v450_v20  ;;  %v472_v29 = vrot.slane %v471_v25, 2 }
 0x101   : > { %v419_v27 = vrot.slane %v418_v22, 1  ;;  %v439_v26 = vadd.f32 %v438_v23, %v437_v19 }
 0x102   : > { %v453_v32 = vrot.slane %v452_v28, 1  ;;  %v473_v33 = vadd.f32 %v472_v29, %v471_v25 }
 0x103   : > { %v420_v30 = vadd.f32 %v419_v27, %v418_v22  ;;  %v440_v31 = vrot.slane %v439_v26, 1 }
 0x104   : > { %v454_v35 = vadd.f32 %v453_v32, %v452_v28  ;;  %v474_v36 = vrot.slane %v473_v33, 1 }
 0x105   : > { %v441_v34 = vadd.f32 %v440_v31, %v439_v26 }
 0x106   : > { %v475_v39 = vadd.f32 %v474_v36, %v473_v33 }
 0x107   : > { %v477_v37 = vsel %vm476_vm2, %v420_v30, %v441_v34 }
 0x108   : > { %v478_v40 = vsel %vm280_vm0, %v477_v37, %v454_v35 }
 0x109   : > { %v480_v41 = vsel %vm479_vm3, %v478_v40, %v475_v39 }
 0x10a   : > { %v481_v42 = vadd.f32 %v480_v41, %v407_v38 }
 0x10c   : > { %482 = vst [vmem:[%s809_s3] sm:$0xf] %v481_v42 }
 0x10d PF: > { %s14_s14 = sadd.s32 1, %s711_s14   ;;  %s810_s12 = smov %s707_s13 }
 0x10e   : > { %p11_p6 = scmp.ge.s32.totalorder %s14_s14, 4   ;;  %s811_s13 = smov %s813_s15 }
 0x110   :  { %13 = sbr.rel (!%p11_p6) target bundleno = 2 (0x2), region = 70 }

// kernel: _lambda_.5
= control target key start
LH: loop header
LB: loop body
LE: loop exit
PB: predicated region body
PF: predicated region fallthrough
CT: control target
= control target key end

     0   :  { %s829_s24 = smov 0   ;;  %s831_s25 = smov 0   ;;  %s894_s0 = inlined_call_operand.vmem [shape: bf16[2,64,128], index: 0, kind: input, shape index: {}]   ;;  %s895_s1 = inlined_call_operand.vmem [shape: bf16[2,64,4], index: 1, kind: input, shape index: {}]   ;;  %s896_s2 = inlined_call_operand.vmem [shape: bf16[4,128], index: 2, kind: input, shape index: {}]   ;;  %s897_s3 = inlined_call_operand.vmem [shape: f32[1,128], index: 3, kind: input, shape index: {}]   ;;  %s898_s4 = inlined_call_operand.vmem [shape: f32[1,128], index: 4, kind: input, shape index: {}]   ;;  %s899_s5 = inlined_call_operand.vmem [shape: f32[1,128], index: 5, kind: input, shape index: {}]   ;;  %s900_s6 = inlined_call_operand.vmem [shape: f32[1,128], index: 6, kind: input, shape index: {}]   ;;  %s901_s7 = inlined_call_operand.vmem [shape: f32[2,64,128], index: 7, kind: output, shape index: {}]  }
   0x1   :  { %s833_s26 = smov 0  }
   0x2 LB: > { %s29_s27 = sadd.s32 1, %s783_s25  ;;  %p675_p0 = scmp.ge.s32.totalorder %s787_s26, 1  ;;  %s787_s26 = sphi %s833_s26, %s17_s26   ;;  %s783_s25 = sphi %s831_s25, %s903_s25   ;;  %s779_s24 = sphi %s829_s24, %s902_s24  }
   0x3   : > { %p31_p1 = scmp.ge.s32.totalorder %s29_s27, 2  ;;  %p275_p2 = scmp.lt.s32.totalorder %s787_s26, 3 }
   0x5   : > { %s905_s27 = smov (%p31_p1, %s29_s27), 0  ;;  %p276_p3 = pnand %p675_p0, %p275_p2 }
   0x6   : > { %p325_p4 = scmp.lt.s32.totalorder (!%p276_p3), %s779_s24, 1 }
   0x7   : > { %279 = sbr.rel (%p276_p3) target bundleno = 226 (0xe2), region = 48 }
   0xc   : > { %v363_v0 = vld [vmem:[%s896_s2] sm:$0x3]  ;;  %vm397_vm0 = vcmask 1041408   ;;  %s907_s24 = smov (!%p325_p4, %s779_s24), 1  ;;  %vm384_vm1 = vcmask 31744  }
   0xd   : > { %735 = vmatprep.subr.msk.bf16.mxu0 %vm397_vm0, %v363_v0  ;;  %736 = vmatprep.subr.msk.bf16.mxu1 %vm397_vm0, %v363_v0  ;;  %v399_v1 = vsel %vm397_vm0, %v363_v0, 0  ;;  %s696_s30 = sshll.u32 %s907_s24, 5  ;;  %v690_v11 = vld [vmem:[%s897_s3] ss:$0 sm:$0xff]  ;;  %s698_s22 = sshll.u32 %s907_s24, 6 }
   0xe   : > { %724 = vmatpush3.bf16.msra.mxu0 %v399_v1  ;;  %734 = vmatpush3.bf16.msra.mxu1 %v399_v1  ;;  %s342_s10 = scalar_lea.vmem %s895_s1, %s696_s30  ;;  %s332_s13 = scalar_lea.vmem %s894_s0, %s696_s30  ;;  %v691_v17 = vld [vmem:[%s898_s4] ss:$0 sm:$0xff] }
   0xf   : > { %v761_v2 = vld [vmem:[%s342_s10] sm:$0xff]   ;;  %v762_v3 = vld [vmem:[%s342_s10 + $0x10] sm:$0xff]   ;;  %v763_v4 = vld [vmem:[%s342_s10 + $0x8] sm:$0xff]   ;;  %s875_s29 = scalar_lea.vmem %s901_s7, %s698_s22 }
  0x10   : > { %725 = vmatprep.mubr.msk.bf16.mxu0 %vm384_vm1, %v761_v2  ;;  %729 = vmatprep.mubr.msk.bf16.mxu1 %vm384_vm1, %v762_v3  ;;  %v764_v5 = vld [vmem:[%s342_s10 + $0x18] sm:$0xff]   ;;  %v715_v6 = vld [vmem:[%s332_s13 + $0x8] sm:$0xff]   ;;  %v700_v8 = vld [vmem:[%s332_s13] sm:$0xff]  }
  0x11   : > { %726 = vmatmul.mubr.msk.bf16.vlgmr.msra.gmra.mxu0 %vm384_vm1, %v763_v4  ;;  %730 = vmatmul.mubr.msk.bf16.vlgmr.msra.gmra.mxu1 %vm384_vm1, %v764_v5  ;;  %v717_v7 = vld [vmem:[%s332_s13 + $0x18] sm:$0xff]   ;;  %v705_v9 = vunpack.c.l.bf16 %v715_v6  ;;  %v716_v10 = vld [vmem:[%s332_s13 + $0x10] sm:$0xff]   ;;  %v701_v13 = vunpack.c.l.bf16 %v700_v8  ;;  %v706_v16 = vunpack.c.h.bf16 %v715_v6  ;;  %v702_v21 = vunpack.c.h.bf16 %v700_v8  ;;  %v692_v22 = vld [vmem:[%s899_s5] ss:$0 sm:$0xff] }
  0x12   : > { %v713_v12 = vunpack.c.l.bf16 %v717_v7  ;;  %v709_v14 = vunpack.c.l.bf16 %v716_v10  ;;  %v714_v19 = vunpack.c.h.bf16 %v717_v7  ;;  %v710_v24 = vunpack.c.h.bf16 %v716_v10  ;;  %v693_v34 = vld [vmem:[%s900_s6] ss:$0 sm:$0xff] }
  0x13   : > { %v491_v15 = vmul.f32 %v705_v9, %v690_v11  ;;  %v489_v20 = vmul.f32 %v701_v13, %v690_v11  ;;  %v492_v26 = vmul.f32 %v706_v16, %v690_v11  ;;  %v490_v33 = vmul.f32 %v702_v21, %v690_v11 }
  0x14   : > { %v495_v18 = vmul.f32 %v713_v12, %v690_v11  ;;  %v493_v23 = vmul.f32 %v709_v14, %v690_v11  ;;  %v496_v29 = vmul.f32 %v714_v19, %v690_v11  ;;  %v494_v38 = vmul.f32 %v710_v24, %v690_v11 }
  0x15   : > { %v506_v25 = vadd.f32 %v691_v17, %v491_v15  ;;  %v504_v32 = vadd.f32 %v691_v17, %v489_v20  ;;  %v507_v42 = vadd.f32 %v691_v17, %v492_v26  ;;  %v505_v51 = vadd.f32 %v691_v17, %v490_v33 }
  0x16   : > { %v510_v28 = vadd.f32 %v691_v17, %v495_v18  ;;  %v508_v37 = vadd.f32 %v691_v17, %v493_v23  ;;  %v511_v46 = vadd.f32 %v691_v17, %v496_v29  ;;  %v509_v56 = vadd.f32 %v691_v17, %v494_v38 }
  0xd1   : > { %v727_v27 = vpop.f32.mrf.mxu0  ;;  %v731_v31 = vpop.f32.mrf.mxu1 }
  0xd2   : > { %v521_v30 = vmul.f32 %v727_v27, %v692_v22  ;;  %v525_v35 = vmul.f32 %v731_v31, %v692_v22 }
  0xd3   : > { %v435_v36 = vpop.f32.mrf.mxu0  ;;  %v451_v41 = vpop.f32.mrf.mxu1 }
  0xd4   : > { %v529_v39 = vadd.f32 %v521_v30, %v506_v25  ;;  %v519_v40 = vmul.f32 %v692_v22, %v435_v36  ;;  %v533_v43 = vadd.f32 %v525_v35, %v510_v28  ;;  %v523_v44 = vmul.f32 %v692_v22, %v451_v41 }
  0xd5   : > { %v728_v45 = vpop.f32.mrf.mxu0  ;;  %v732_v50 = vpop.f32.mrf.mxu1 }
  0xd6   : > { %v544_v47 = vadd.f32 %v693_v34, %v529_v39  ;;  %v527_v48 = vadd.f32 %v519_v40, %v504_v32  ;;  %v522_v49 = vmul.f32 %v728_v45, %v692_v22  ;;  %v548_v52 = vadd.f32 %v693_v34, %v533_v43 }
  0xd7   : > { %v531_v53 = vadd.f32 %v523_v44, %v508_v37  ;;  %v526_v54 = vmul.f32 %v732_v50, %v692_v22  ;;  %v438_v55 = vpop.f32.mrf.mxu0  ;;  %v454_v61 = vpop.f32.mrf.mxu1 }
  0xd8   : > { %v552_v57 = vmax.f32 %v544_v47, 0.0  ;;  %v542_v58 = vadd.f32 %v693_v34, %v527_v48  ;;  %v530_v59 = vadd.f32 %v522_v49, %v507_v42  ;;  %v520_v60 = vmul.f32 %v692_v22, %v438_v55 }
  0xd9   : > { %v556_v62 = vmax.f32 %v548_v52, 0.0  ;;  %v546_v63 = vadd.f32 %v693_v34, %v531_v53  ;;  %v534_v0 = vadd.f32 %v526_v54, %v511_v46  ;;  %v524_v1 = vmul.f32 %v692_v22, %v454_v61 }
  0xda   : > { %560 = vst [vmem:[%s875_s29 + $0x10] sm:$0xff] %v552_v57  ;;  %v550_v2 = vmax.f32 %v542_v58, 0.0  ;;  %v545_v3 = vadd.f32 %v693_v34, %v530_v59  ;;  %v528_v4 = vadd.f32 %v520_v60, %v505_v51 }
  0xdb   : > { %564 = vst [vmem:[%s875_s29 + $0x30] sm:$0xff] %v556_v62  ;;  %v554_v5 = vmax.f32 %v546_v63, 0.0  ;;  %v549_v6 = vadd.f32 %v693_v34, %v534_v0  ;;  %v532_v7 = vadd.f32 %v524_v1, %v509_v56 }
  0xdc   : > { %558 = vst [vmem:[%s875_s29] sm:$0xff] %v550_v2  ;;  %v553_v8 = vmax.f32 %v545_v3, 0.0  ;;  %v543_v9 = vadd.f32 %v693_v34, %v528_v4 }
  0xdd   : > { %562 = vst [vmem:[%s875_s29 + $0x20] sm:$0xff] %v554_v5  ;;  %v557_v10 = vmax.f32 %v549_v6, 0.0  ;;  %v547_v11 = vadd.f32 %v693_v34, %v532_v7 }
  0xde   : > { %561 = vst [vmem:[%s875_s29 + $0x18] sm:$0xff] %v553_v8  ;;  %v551_v12 = vmax.f32 %v543_v9, 0.0 }
  0xdf   : > { %565 = vst [vmem:[%s875_s29 + $0x38] sm:$0xff] %v557_v10  ;;  %v555_v13 = vmax.f32 %v547_v11, 0.0 }
  0xe0   : > { %559 = vst [vmem:[%s875_s29 + $0x8] sm:$0xff] %v551_v12 }
  0xe1   : > { %563 = vst [vmem:[%s875_s29 + $0x28] sm:$0xff] %v555_v13 }
  0xe2 PF: > { %s17_s26 = sadd.s32 1, %s787_s26   ;;  %s902_s24 = smov %s783_s25 }
  0xe3   : > { %p14_p5 = scmp.ge.s32.totalorder %s17_s26, 4   ;;  %s903_s25 = smov %s905_s27 }
  0xe5   :  { %16 = sbr.rel (!%p14_p5) target bundleno = 2 (0x2), region = 81 }

// kernel: _lambda_.4
= control target key start
LH: loop header
LB: loop body
LE: loop exit
PB: predicated region body
PF: predicated region fallthrough
CT: control target
= control target key end

     0   :  { %s2996_s18 = smov 0   ;;  %s3417_s0 = inlined_call_operand.vmem [shape: bf16[2,8,8,128], index: 0, kind: input, shape index: {}]   ;;  %s3418_s1 = inlined_call_operand.vmem [shape: f32[1,128], index: 1, kind: input, shape index: {}]   ;;  %s3419_s2 = inlined_call_operand.vmem [shape: f32[1,128], index: 2, kind: input, shape index: {}]   ;;  %s3420_s3 = inlined_call_operand.vmem [shape: bf16[3,3,128,128], index: 3, kind: input, shape index: {}]   ;;  %s3421_s4 = inlined_call_operand.vmem [shape: bf16[2,64,128], index: 4, kind: output, shape index: {0}]   ;;  %s3422_s5 = inlined_call_operand.vmem [shape: f32[2,128], index: 5, kind: output, shape index: {1}]  }
   0x1 LB: > { %s2190_s19 = sadd.s32 4294967295, %s2963_s18   ;;  %p2194_p0 = scmp.ge.s32.totalorder %s2963_s18, 1  ;;  %s2963_s18 = sphi %s2996_s18, %s16_s18  }
   0x2   : > { %p185_p1 = scmp.lt.s32.totalorder %s2963_s18, 3 }
   0x4   : > { %p186_p2 = pnand %p2194_p0, %p185_p1 }
   0x6   : > { %189 = sbr.rel (%p186_p2) target bundleno = 425 (0x1a9), region = 36 }
   0xb   : > { %p213_p3 = scmp.lt.s32.totalorder %s2190_s19, 1  ;;  %p2199_p4 = scmp.ne.s32.totalorder %s2190_s19, 0 }
   0xd   : > { %s214_s20 = scalar_select %p213_p3, %s2190_s19, 1 }
   0xe   : > { %227 = sbr.rel (%p2199_p4) target bundleno = 31 (0x1f), region = 40 }
   0xf   : > { %s2448_s21 = sshll.u32 %s214_s20, 5 }
  0x10   : > { %s3007_s24 = scalar_lea.vmem %s3417_s0, %s2448_s21  ;;  %s3012_s27 = scalar_lea.vmem %s3421_s4, %s2448_s21 }
  0x13   : > { %v2965_v0 = vmov 0.0  }
  0x14   : > { %228 = vst [vmem:[#allocation2] sm:$0xff] %v2965_v0  ;;  %229 = vst [vmem:[#allocation2 + $0x8] sm:$0xff] %v2965_v0 }
  0x15   : > { %230 = vst [vmem:[#allocation2 + $0x10] sm:$0xff] %v2965_v0  ;;  %231 = vst [vmem:[#allocation2 + $0x18] sm:$0xff] %v2965_v0 }
  0x16   : > { %232 = vst [vmem:[#allocation2 + $0x20] sm:$0xff] %v2965_v0  ;;  %233 = vst [vmem:[#allocation2 + $0x28] sm:$0xff] %v2965_v0 }
  0x17   : > { %234 = vst [vmem:[#allocation2 + $0x30] sm:$0xff] %v2965_v0  ;;  %235 = vst [vmem:[#allocation2 + $0x38] sm:$0xff] %v2965_v0 }
  0x18   : > { %236 = vst [vmem:[#allocation2 + $0x40] sm:$0xff] %v2965_v0  ;;  %237 = vst [vmem:[#allocation2 + $0x48] sm:$0xff] %v2965_v0 }
  0x19   : > { %238 = vst [vmem:[#allocation2 + $0x50] sm:$0xff] %v2965_v0  ;;  %239 = vst [vmem:[#allocation2 + $0x58] sm:$0xff] %v2965_v0 }
  0x1a   : > { %240 = vst [vmem:[#allocation2 + $0x60] sm:$0xff] %v2965_v0  ;;  %241 = vst [vmem:[#allocation2 + $0x68] sm:$0xff] %v2965_v0 }
  0x1b   : > { %242 = vst [vmem:[#allocation2 + $0x70] sm:$0xff] %v2965_v0  ;;  %243 = vst [vmem:[#allocation2 + $0x78] sm:$0xff] %v2965_v0 }
  0x1c   : > { %244 = vst [vmem:[#allocation2 + $0x80] sm:$0xff] %v2965_v0  ;;  %245 = vst [vmem:[#allocation2 + $0x88] sm:$0xff] %v2965_v0 }
  0x1d   : > { %246 = vst [vmem:[#allocation2 + $0x90] sm:$0xff] %v2965_v0  ;;  %247 = vst [vmem:[#allocation2 + $0x98] sm:$0xff] %v2965_v0 }
  0x1e   : > { %248 = vst [vmem:[%s3422_s5] sm:$0x3] %v2965_v0 }
  0x1f PF: > { %v2885_v1 = vld [vmem:[%s3420_s3 + $0x38] sm:$0xff]   ;;  %v2887_v3 = vld [vmem:[%s3420_s3 + $0x30] sm:$0xff]   ;;  %v2889_v5 = vld [vmem:[%s3420_s3 + $0x28] sm:$0xff]   ;;  %vm2125_vm0 = vcmask 1040384  }
  0x20   : > { %v2886_v2 = vld [vmem:[%s3420_s3 + $0x78] sm:$0xff]   ;;  %2644 = vmatprep.subr.bf16.mxu0 %v2885_v1  ;;  %v2888_v4 = vld [vmem:[%s3420_s3 + $0x70] sm:$0xff]   ;;  %v2890_v6 = vld [vmem:[%s3420_s3 + $0x68] sm:$0xff]  }
  0x21   : > { %2668 = vmatprep.subr.bf16.mxu1 %v2886_v2  ;;  %2645 = vmatpush3.bf16.msra.mxu0 %v2885_v1  ;;  %v2891_v7 = vld [vmem:[%s3420_s3 + $0x20] sm:$0xff]   ;;  %v2893_v9 = vld [vmem:[%s3420_s3 + $0x18] sm:$0xff]   ;;  %v2895_v11 = vld [vmem:[%s3420_s3 + $0x10] sm:$0xff]  }
  0x22   : > { %2669 = vmatpush3.bf16.msra.mxu1 %v2886_v2  ;;  %2646 = vmatprep.subr.bf16.mxu0 %v2887_v3  ;;  %v2892_v8 = vld [vmem:[%s3420_s3 + $0x60] sm:$0xff]   ;;  %v2894_v10 = vld [vmem:[%s3420_s3 + $0x58] sm:$0xff]   ;;  %v2896_v14 = vld [vmem:[%s3420_s3 + $0x50] sm:$0xff]  }
  0x23   : > { %2670 = vmatprep.subr.bf16.mxu1 %v2888_v4  ;;  %v2495_v12 = vld [vmem:[%s3007_s24] sm:$0xff]   ;;  %v2530_v17 = vld [vmem:[%s3007_s24 + $0x8] sm:$0xff]   ;;  %v2901_v40 = vld [vmem:[%s3420_s3 + $0xb8] sm:$0xff]  }
  0x24   : > { %v2200_v13 = vld [vmem:[%s3418_s1] ss:$0 sm:$0xff]  ;;  %v2496_v15 = vunpack.c.l.bf16 %v2495_v12  ;;  %v2497_v16 = vunpack.c.h.bf16 %v2495_v12  ;;  %v2500_v19 = vunpack.c.l.bf16 %v2530_v17  ;;  %v2501_v20 = vunpack.c.h.bf16 %v2530_v17  ;;  %v2897_v23 = vld [vmem:[%s3420_s3 + $0x8] sm:$0xff]   ;;  %v2531_v41 = vld [vmem:[%s3007_s24 + $0x10] sm:$0xff]  }
  0x25   : > { %2647 = vmatpush3.bf16.msra.mxu0 %v2887_v3  ;;  %v3061_v18 = vld [vmem:[%s3419_s2] ss:$0 sm:$0xff]  ;;  %v2898_v26 = vld [vmem:[%s3420_s3 + $0x48] sm:$0xff]   ;;  %v2532_v42 = vld [vmem:[%s3007_s24 + $0x18] sm:$0xff]   ;;  %v2504_v44 = vunpack.c.l.bf16 %v2531_v41  ;;  %v2505_v45 = vunpack.c.h.bf16 %v2531_v41 }
  0x26   : > { %2671 = vmatpush3.bf16.msra.mxu1 %v2888_v4  ;;  %2648 = vmatprep.subr.bf16.mxu0 %v2889_v5  ;;  %v272_v21 = vmul.f32 %v2496_v15, %v2200_v13  ;;  %v273_v22 = vmul.f32 %v2497_v16, %v2200_v13  ;;  %v274_v24 = vmul.f32 %v2500_v19, %v2200_v13  ;;  %v489_v29 = vld [vmem:[#allocation2 + $0x1] sm:$0xff]  ;;  %v2902_v43 = vld [vmem:[%s3420_s3 + $0xf8] sm:$0xff]   ;;  %v2508_v46 = vunpack.c.l.bf16 %v2532_v42  ;;  %v2904_v58 = vld [vmem:[%s3420_s3 + $0xf0] sm:$0xff]  }
  0x27   : > { %2672 = vmatprep.subr.bf16.mxu1 %v2890_v6  ;;  %v275_v25 = vmul.f32 %v2501_v20, %v2200_v13  ;;  %v2899_v34 = vld [vmem:[%s3420_s3] sm:$0xff]   ;;  %v2509_v47 = vunpack.c.h.bf16 %v2532_v42  ;;  %v276_v50 = vmul.f32 %v2504_v44, %v2200_v13  ;;  %v277_v51 = vmul.f32 %v2505_v45, %v2200_v13  ;;  %v2903_v63 = vld [vmem:[%s3420_s3 + $0xb0] sm:$0xff]   ;;  %v2910_v20 = vld [vmem:[%s3420_s3 + $0xd8] sm:$0xff]  }
  0x28   : > { %v287_v27 = vadd.f32 %v3061_v18, %v272_v21  ;;  %v288_v28 = vadd.f32 %v3061_v18, %v273_v22  ;;  %v289_v30 = vadd.f32 %v3061_v18, %v274_v24  ;;  %v2900_v36 = vld [vmem:[%s3420_s3 + $0x40] sm:$0xff]   ;;  %v278_v52 = vmul.f32 %v2508_v46, %v2200_v13  ;;  %v2920_v44 = vld [vmem:[%s3420_s3 + $0x170] sm:$0xff]  }
  0x29   : > { %2649 = vmatpush3.bf16.msra.mxu0 %v2889_v5  ;;  %v290_v31 = vadd.f32 %v3061_v18, %v275_v25  ;;  %v312_v48 = vld [vmem:[#allocation2] sm:$0xff]  ;;  %v279_v53 = vmul.f32 %v2509_v47, %v2200_v13  ;;  %v291_v59 = vadd.f32 %v3061_v18, %v276_v50  ;;  %v292_v60 = vadd.f32 %v3061_v18, %v277_v51  ;;  %v2906_v5 = vld [vmem:[%s3420_s3 + $0xe8] sm:$0xff]   ;;  %v2912_v25 = vld [vmem:[%s3420_s3 + $0xd0] sm:$0xff]  }
  0x2a   : > { %2673 = vmatpush3.bf16.msra.mxu1 %v2890_v6  ;;  %2650 = vmatprep.subr.bf16.mxu0 %v2891_v7  ;;  %v3073_v32 = vmax.f32 %v287_v27, 0.0  ;;  %v3075_v33 = vmax.f32 %v288_v28, 0.0  ;;  %v3080_v35 = vmax.f32 %v289_v30, 0.0  ;;  %v293_v61 = vadd.f32 %v3061_v18, %v278_v52  ;;  %v2908_v12 = vld [vmem:[%s3420_s3 + $0xe0] sm:$0xff]   ;;  %v2914_v27 = vld [vmem:[%s3420_s3 + $0xc8] sm:$0xff]   ;;  %v2919_v45 = vld [vmem:[%s3420_s3 + $0x130] sm:$0xff]  }
  0x2b   : > { %2674 = vmatprep.subr.bf16.mxu1 %v2892_v8  ;;  %v3088_v38 = vmax.f32 %v290_v31, 0.0  ;;  %v294_v0 = vadd.f32 %v3061_v18, %v279_v53  ;;  %v3122_v1 = vmax.f32 %v291_v59, 0.0  ;;  %v3124_v2 = vmax.f32 %v292_v60, 0.0  ;;  %v683_v15 = vld [vmem:[#allocation2 + $0x2] sm:$0xff]  ;;  %v2926_v60 = vld [vmem:[%s3420_s3 + $0x158] sm:$0xff]  }
  0x2c   : > { %304 = vst [vmem:[#allocation2 + $0x11] sm:$0xff] %v3073_v32  ;;  %v2454_v37 = vpack.c.bf16 %v3073_v32, %v489_v29  ;;  %305 = vst [vmem:[#allocation2 + $0x21] sm:$0xff] %v3075_v33  ;;  %v3104_v49 = vpack.c.bf16 %v3080_v35, %v3075_v33  ;;  %v3126_v3 = vmax.f32 %v293_v61, 0.0  ;;  %v2913_v28 = vld [vmem:[%s3420_s3 + $0x88] sm:$0xff]   ;;  %v2916_v29 = vld [vmem:[%s3420_s3 + $0xc0] sm:$0xff]  }
  0x2d   : > { %2651 = vmatpush3.bf16.msra.mxu0 %v2891_v7  ;;  %306 = vst [vmem:[#allocation2 + $0x31] sm:$0xff] %v3080_v35  ;;  %307 = vst [vmem:[#allocation2 + $0x41] sm:$0xff] %v3088_v38  ;;  %v2467_v39 = vpack.c.bf16 %v3088_v38, %v3080_v35  ;;  %v3129_v4 = vmax.f32 %v294_v0, 0.0  ;;  %v3137_v6 = vpack.c.bf16 %v3122_v1, %v3088_v38  ;;  %v2915_v30 = vld [vmem:[%s3420_s3 + $0x80] sm:$0xff]   ;;  %v2922_v52 = vld [vmem:[%s3420_s3 + $0x168] sm:$0xff]  }
  0x2e   : > { %2675 = vmatpush3.bf16.msra.mxu1 %v2892_v8  ;;  %2652 = vmatprep.subr.bf16.mxu0 %v2893_v9  ;;  %308 = vst [vmem:[#allocation2 + $0x51] sm:$0xff] %v3122_v1  ;;  %309 = vst [vmem:[#allocation2 + $0x61] sm:$0xff] %v3124_v2  ;;  %v2468_v7 = vpack.c.bf16 %v3124_v2, %v3122_v1  ;;  %v2905_v8 = vld [vmem:[%s3420_s3 + $0xa8] sm:$0xff]   ;;  %v2925_v61 = vld [vmem:[%s3420_s3 + $0x118] sm:$0xff]  }
  0x2f   : > { %2676 = vmatprep.subr.bf16.mxu1 %v2894_v10  ;;  %2684 = vmatprep.mubr.bf16.mxu1 %v2454_v37  ;;  %310 = vst [vmem:[#allocation2 + $0x71] sm:$0xff] %v3126_v3  ;;  %311 = vst [vmem:[#allocation2 + $0x81] sm:$0xff] %v3129_v4  ;;  %v2917_v37 = vld [vmem:[%s3420_s3 + $0x138] sm:$0xff]   ;;  %v2921_v53 = vld [vmem:[%s3420_s3 + $0x128] sm:$0xff]  }
  0x30   : > { %v2929_v0 = vld [vmem:[%s3420_s3 + $0x108] sm:$0xff]   ;;  %v2940_v38 = vld [vmem:[%s3420_s3 + $0x1e0] sm:$0xff]   ;;  %v2942_v1 = vld [vmem:[%s3420_s3 + $0x1d8] sm:$0xff]  }
  0x31   : > { %2653 = vmatpush3.bf16.msra.mxu0 %v2893_v9  ;;  %v2469_v9 = vpack.c.bf16 %v3129_v4, %v3126_v3 }
  0x32   : > { %2677 = vmatpush3.bf16.msra.mxu1 %v2894_v10  ;;  %2654 = vmatprep.subr.bf16.mxu0 %v2895_v11  ;;  %v3152_v10 = vpack.c.bf16 %v3126_v3, %v3124_v2  ;;  %v2941_v2 = vld [vmem:[%s3420_s3 + $0x198] sm:$0xff]   ;;  %v2944_v3 = vld [vmem:[%s3420_s3 + $0x1d0] sm:$0xff]  }
  0x33   : > { %2678 = vmatprep.subr.bf16.mxu1 %v2896_v14  ;;  %v313_v54 = vld [vmem:[#allocation2 + $0x10] sm:$0xff]  ;;  %v314_v55 = vld [vmem:[#allocation2 + $0x20] sm:$0xff] }
  0x34   : > { %v2450_v56 = vpack.c.bf16 %v313_v54, %v312_v48  ;;  %v3106_v57 = vld [vmem:[#allocation2 + $0x30] sm:$0xff]  ;;  %v2462_v13 = vpack.c.bf16 %v314_v55, %v313_v54  ;;  %v685_v31 = vld [vmem:[#allocation2 + $0x22] sm:$0xff] }
  0x35   : > { %2655 = vmatpush3.bf16.msra.mxu0 %v2895_v11  ;;  %v3115_v62 = vpack.c.bf16 %v3106_v57, %v314_v55  ;;  %v2907_v11 = vld [vmem:[%s3420_s3 + $0xa0] sm:$0xff]   ;;  %v3161_v16 = vld [vmem:[#allocation2 + $0x12] sm:$0xff] }
  0x36   : > { %2679 = vmatpush3.bf16.msra.mxu1 %v2896_v14  ;;  %2656 = vmatprep.subr.bf16.mxu0 %v2897_v23  ;;  %v316_v14 = vld [vmem:[#allocation2 + $0x40] sm:$0xff]  ;;  %v3163_v17 = vld [vmem:[#allocation2 + $0x50] sm:$0xff]  ;;  %v2458_v24 = vpack.c.bf16 %v3161_v16, %v683_v15  ;;  %v2470_v59 = vpack.c.bf16 %v685_v31, %v3161_v16 }
  0x37   : > { %2680 = vmatprep.subr.bf16.mxu1 %v2898_v26  ;;  %2660 = vmatprep.mubr.bf16.mxu0 %v2450_v56  ;;  %v3165_v18 = vld [vmem:[#allocation2 + $0x60] sm:$0xff]  ;;  %v3167_v19 = vld [vmem:[#allocation2 + $0x70] sm:$0xff]  ;;  %v3173_v21 = vpack.c.bf16 %v3163_v17, %v316_v14  ;;  %v2463_v41 = vpack.c.bf16 %v316_v14, %v3106_v57 }
  0x38   : > { %v3177_v22 = vpack.c.bf16 %v3167_v19, %v3165_v18  ;;  %v3214_v42 = vld [vmem:[#allocation2 + $0x52] sm:$0xff]  ;;  %v3229_v47 = vld [vmem:[#allocation2 + $0x62] sm:$0xff]  ;;  %v2464_v50 = vpack.c.bf16 %v3165_v18, %v3163_v17 }
  0x39   : > { %2657 = vmatpush3.bf16.msra.mxu0 %v2897_v23  ;;  %v2909_v23 = vld [vmem:[%s3420_s3 + $0x98] sm:$0xff]   ;;  %v3236_v51 = vld [vmem:[#allocation2 + $0x80] sm:$0xff]  ;;  %v2936_v14 = vld [vmem:[%s3420_s3 + $0x1f0] sm:$0xff]   ;;  %v2472_v16 = vpack.c.bf16 %v3229_v47, %v3214_v42 }
  0x3a   : > { %2681 = vmatpush3.bf16.msra.mxu1 %v2898_v26  ;;  %2658 = vmatprep.subr.bf16.mxu0 %v2899_v34  ;;  %v2911_v26 = vld [vmem:[%s3420_s3 + $0x90] sm:$0xff]   ;;  %v2465_v54 = vpack.c.bf16 %v3236_v51, %v3167_v19  ;;  %v2924_v56 = vld [vmem:[%s3420_s3 + $0x160] sm:$0xff]   ;;  %v2938_v18 = vld [vmem:[%s3420_s3 + $0x1e8] sm:$0xff]  }
  0x3b   : > { %2682 = vmatprep.subr.bf16.mxu1 %v2900_v36  ;;  %v3231_v48 = vld [vmem:[#allocation2 + $0x72] sm:$0xff]  ;;  %v2923_v57 = vld [vmem:[%s3420_s3 + $0x120] sm:$0xff]   ;;  %v2937_v19 = vld [vmem:[%s3420_s3 + $0x1a8] sm:$0xff]  }
  0x3c   : > { %v3249_v55 = vpack.c.bf16 %v3231_v48, %v3229_v47  ;;  %v2935_v15 = vld [vmem:[%s3420_s3 + $0x1b0] sm:$0xff]   ;;  %v3304_v17 = vld [vmem:[#allocation2 + $0x82] sm:$0xff] }
  0x3d   : > { %2659 = vmatpush3.bf16.msra.mxu0 %v2899_v34  ;;  %v3203_v34 = vld [vmem:[#allocation2 + $0x32] sm:$0xff]  ;;  %v2473_v35 = vpack.c.bf16 %v3304_v17, %v3231_v48 }
  0x3e   : > { %2683 = vmatpush3.bf16.msra.mxu1 %v2900_v36  ;;  %2692 = vmatprep.subr.bf16.mxu0 %v2901_v40  ;;  %v2918_v36 = vld [vmem:[%s3420_s3 + $0x178] sm:$0xff]  }
  0x3f   : > { %2716 = vmatprep.subr.bf16.mxu1 %v2902_v43 }
  0x40   : > { %2661 = vmatmul.mubr.bf16.vlgmr.msra.gmra.mxu0 %v3115_v62 }
  0x41   : > { %2685 = vmatmul.mubr.bf16.vlgmr.msra.gmra.mxu1 %v3104_v49  ;;  %2693 = vmatpush3.bf16.msra.mxu0 %v2901_v40  ;;  %v3211_v40 = vld [vmem:[#allocation2 + $0x42] sm:$0xff] }
  0x42   : > { %2717 = vmatpush3.bf16.msra.mxu1 %v2902_v43  ;;  %2694 = vmatprep.subr.bf16.mxu0 %v2903_v63  ;;  %v3217_v43 = vpack.c.bf16 %v3203_v34, %v685_v31  ;;  %v3227_v46 = vpack.c.bf16 %v3214_v42, %v3211_v40 }
  0x43   : > { %2718 = vmatprep.subr.bf16.mxu1 %v2904_v58  ;;  %2688 = vmatprep.mubr.bf16.mxu1 %v3137_v6 }
  0x44   : > { %2664 = vmatprep.mubr.bf16.mxu0 %v3173_v21 }
  0x45   : > { %2695 = vmatpush3.bf16.msra.mxu0 %v2903_v63  ;;  %v2930_v63 = vld [vmem:[%s3420_s3 + $0x148] sm:$0xff]  }
  0x46   : > { %2719 = vmatpush3.bf16.msra.mxu1 %v2904_v58  ;;  %2696 = vmatprep.subr.bf16.mxu0 %v2905_v8  ;;  %v2466_v58 = vpack.c.bf16 %v3075_v33, %v3073_v32  ;;  %v2928_v32 = vld [vmem:[%s3420_s3 + $0x150] sm:$0xff]  }
  0x47   : > { %2720 = vmatprep.subr.bf16.mxu1 %v2906_v5  ;;  %v2927_v33 = vld [vmem:[%s3420_s3 + $0x110] sm:$0xff]  }
  0x48   : > { %2665 = vmatmul.mubr.bf16.gmra.mxu0 %v3177_v22 }
  0x49   : > { %2689 = vmatmul.mubr.bf16.gmra.mxu1 %v3152_v10  ;;  %2697 = vmatpush3.bf16.msra.mxu0 %v2905_v8  ;;  %v2931_v8 = vld [vmem:[%s3420_s3 + $0x100] sm:$0xff]  }
  0x4a   : > { %2721 = vmatpush3.bf16.msra.mxu1 %v2906_v5  ;;  %2732 = vmatprep.mubr.bf16.mxu1 %v2462_v13  ;;  %v2932_v5 = vld [vmem:[%s3420_s3 + $0x140] sm:$0xff]   ;;  %v2471_v13 = vpack.c.bf16 %v3211_v40, %v3203_v34 }
  0x4b   : > { %2722 = vmatprep.subr.bf16.mxu1 %v2908_v12  ;;  %2698 = vmatprep.subr.bf16.mxu0 %v2907_v11 }
  0x4c   : > { %2708 = vmatprep.mubr.bf16.mxu0 %v2458_v24  ;;  %v2950_v24 = vld [vmem:[%s3420_s3 + $0x230] sm:$0xff]  }
  0x4d   : > { %2699 = vmatpush3.bf16.msra.mxu0 %v2907_v11  ;;  %v2934_v11 = vld [vmem:[%s3420_s3 + $0x1f8] sm:$0xff]  }
  0x4e   : > { %2723 = vmatpush3.bf16.msra.mxu1 %v2908_v12  ;;  %2700 = vmatprep.subr.bf16.mxu0 %v2909_v23  ;;  %v2933_v12 = vld [vmem:[%s3420_s3 + $0x1b8] sm:$0xff]  }
  0x4f   : > { %2724 = vmatprep.subr.bf16.mxu1 %v2910_v20 }
  0x51   : > { %2701 = vmatpush3.bf16.msra.mxu0 %v2909_v23  ;;  %v2949_v23 = vld [vmem:[%s3420_s3 + $0x238] sm:$0xff]  }
  0x52   : > { %2725 = vmatpush3.bf16.msra.mxu1 %v2910_v20  ;;  %2702 = vmatprep.subr.bf16.mxu0 %v2911_v26  ;;  %v2947_v20 = vld [vmem:[%s3420_s3 + $0x180] sm:$0xff]  }
  0x53   : > { %2726 = vmatprep.subr.bf16.mxu1 %v2912_v25 }
  0x55   : > { %2703 = vmatpush3.bf16.msra.mxu0 %v2911_v26  ;;  %v1467_v26 = vld [vmem:[#allocation2 + $0x90] sm:$0xff] }
  0x56   : > { %2727 = vmatpush3.bf16.msra.mxu1 %v2912_v25  ;;  %2704 = vmatprep.subr.bf16.mxu0 %v2913_v28  ;;  %v1661_v25 = vld [vmem:[#allocation2 + $0x91] sm:$0xff] }
  0x57   : > { %2728 = vmatprep.subr.bf16.mxu1 %v2914_v27 }
  0x59   : > { %2705 = vmatpush3.bf16.msra.mxu0 %v2913_v28  ;;  %v2481_v28 = vpack.c.bf16 %v1661_v25, %v3129_v4  ;;  %v2954_v4 = vld [vmem:[%s3420_s3 + $0x210] sm:$0xff]  }
  0x5a   : > { %2729 = vmatpush3.bf16.msra.mxu1 %v2914_v27  ;;  %2706 = vmatprep.subr.bf16.mxu0 %v2915_v30  ;;  %v2951_v27 = vld [vmem:[%s3420_s3 + $0x228] sm:$0xff]  }
  0x5b   : > { %2730 = vmatprep.subr.bf16.mxu1 %v2916_v29 }
  0x5d   : > { %2707 = vmatpush3.bf16.msra.mxu0 %v2915_v30  ;;  %v1855_v30 = vld [vmem:[#allocation2 + $0x92] sm:$0xff] }
  0x5e   : > { %2731 = vmatpush3.bf16.msra.mxu1 %v2916_v29  ;;  %2740 = vmatprep.subr.bf16.mxu0 %v2917_v37  ;;  %v2956_v29 = vld [vmem:[%s3420_s3 + $0x200] sm:$0xff]   ;;  %v2485_v31 = vpack.c.bf16 %v1855_v30, %v3304_v17 }
  0x5f   : > { %2764 = vmatprep.subr.bf16.mxu1 %v2918_v36 }
  0x60   : > { %2709 = vmatmul.mubr.bf16.vlgmr.msra.gmra.mxu0 %v3217_v43 }
  0x61   : > { %2733 = vmatmul.mubr.bf16.vlgmr.msra.gmra.mxu1 %v2463_v41  ;;  %2741 = vmatpush3.bf16.msra.mxu0 %v2917_v37 }
  0x62   : > { %2765 = vmatpush3.bf16.msra.mxu1 %v2918_v36  ;;  %2742 = vmatprep.subr.bf16.mxu0 %v2919_v45 }
  0x63   : > { %2766 = vmatprep.subr.bf16.mxu1 %v2920_v44  ;;  %2712 = vmatprep.mubr.bf16.mxu0 %v3227_v46 }
  0x64   : > { %2736 = vmatprep.mubr.bf16.mxu1 %v2464_v50 }
  0x65   : > { %2743 = vmatpush3.bf16.msra.mxu0 %v2919_v45 }
  0x66   : > { %2767 = vmatpush3.bf16.msra.mxu1 %v2920_v44  ;;  %2744 = vmatprep.subr.bf16.mxu0 %v2921_v53 }
  0x67   : > { %2768 = vmatprep.subr.bf16.mxu1 %v2922_v52 }
  0x68   : > { %2713 = vmatmul.mubr.bf16.gmra.mxu0 %v3249_v55 }
  0x69   : > { %2737 = vmatmul.mubr.bf16.gmra.mxu1 %v2465_v54  ;;  %2745 = vmatpush3.bf16.msra.mxu0 %v2921_v53 }
  0x6a   : > { %2769 = vmatpush3.bf16.msra.mxu1 %v2922_v52  ;;  %2746 = vmatprep.subr.bf16.mxu0 %v2923_v57 }
  0x6b   : > { %2770 = vmatprep.subr.bf16.mxu1 %v2924_v56  ;;  %2756 = vmatprep.mubr.bf16.mxu0 %v2466_v58 }
  0x6c   : > { %2780 = vmatprep.mubr.bf16.mxu1 %v2470_v59 }
  0x6d   : > { %2747 = vmatpush3.bf16.msra.mxu0 %v2923_v57 }
  0x6e   : > { %2771 = vmatpush3.bf16.msra.mxu1 %v2924_v56  ;;  %2748 = vmatprep.subr.bf16.mxu0 %v2925_v61 }
  0x6f   : > { %2772 = vmatprep.subr.bf16.mxu1 %v2926_v60 }
  0x71   : > { %2749 = vmatpush3.bf16.msra.mxu0 %v2925_v61 }
  0x72   : > { %2773 = vmatpush3.bf16.msra.mxu1 %v2926_v60  ;;  %2750 = vmatprep.subr.bf16.mxu0 %v2927_v33 }
  0x73   : > { %2774 = vmatprep.subr.bf16.mxu1 %v2928_v32 }
  0x75   : > { %2751 = vmatpush3.bf16.msra.mxu0 %v2927_v33 }
  0x76   : > { %2775 = vmatpush3.bf16.msra.mxu1 %v2928_v32  ;;  %2752 = vmatprep.subr.bf16.mxu0 %v2929_v0 }
  0x77   : > { %2776 = vmatprep.subr.bf16.mxu1 %v2930_v63 }
  0x79   : > { %2753 = vmatpush3.bf16.msra.mxu0 %v2929_v0 }
  0x7a   : > { %2777 = vmatpush3.bf16.msra.mxu1 %v2930_v63  ;;  %2754 = vmatprep.subr.bf16.mxu0 %v2931_v8 }
  0x7b   : > { %2778 = vmatprep.subr.bf16.mxu1 %v2932_v5 }
  0x7d   : > { %2755 = vmatpush3.bf16.msra.mxu0 %v2931_v8 }
  0x7e   : > { %2779 = vmatpush3.bf16.msra.mxu1 %v2932_v5  ;;  %2788 = vmatprep.subr.bf16.mxu0 %v2933_v12 }
  0x7f   : > { %2812 = vmatprep.subr.bf16.mxu1 %v2934_v11 }
  0x80   : > { %2757 = vmatmul.mubr.bf16.vlgmr.msra.gmra.mxu0 %v2467_v39  ;;  %v2939_v39 = vld [vmem:[%s3420_s3 + $0x1a0] sm:$0xff]  }
  0x81   : > { %2781 = vmatmul.mubr.bf16.vlgmr.msra.gmra.mxu1 %v2471_v13  ;;  %2789 = vmatpush3.bf16.msra.mxu0 %v2933_v12 }
  0x82   : > { %2813 = vmatpush3.bf16.msra.mxu1 %v2934_v11  ;;  %2790 = vmatprep.subr.bf16.mxu0 %v2935_v15 }
  0x83   : > { %2814 = vmatprep.subr.bf16.mxu1 %v2936_v14  ;;  %2760 = vmatprep.mubr.bf16.mxu0 %v2468_v7  ;;  %v2943_v7 = vld [vmem:[%s3420_s3 + $0x190] sm:$0xff]  }
  0x84   : > { %2784 = vmatprep.mubr.bf16.mxu1 %v2472_v16 }
  0x85   : > { %2791 = vmatpush3.bf16.msra.mxu0 %v2935_v15 }
  0x86   : > { %2815 = vmatpush3.bf16.msra.mxu1 %v2936_v14  ;;  %2792 = vmatprep.subr.bf16.mxu0 %v2937_v19 }
  0x87   : > { %2816 = vmatprep.subr.bf16.mxu1 %v2938_v18 }
  0x88   : > { %2761 = vmatmul.mubr.bf16.gmra.mxu0 %v2469_v9  ;;  %v2948_v9 = vld [vmem:[%s3420_s3 + $0x1c0] sm:$0xff]  }
  0x89   : > { %2785 = vmatmul.mubr.bf16.gmra.mxu1 %v2473_v35  ;;  %2793 = vmatpush3.bf16.msra.mxu0 %v2937_v19 }
  0x8a   : > { %2817 = vmatpush3.bf16.msra.mxu1 %v2938_v18  ;;  %2794 = vmatprep.subr.bf16.mxu0 %v2939_v39 }
  0x8b   : > { %2818 = vmatprep.subr.bf16.mxu1 %v2940_v38  ;;  %2804 = vmatprep.mubr.bf16.mxu0 %v3115_v62  ;;  %v2946_v62 = vld [vmem:[%s3420_s3 + $0x1c8] sm:$0xff]  }
  0x8c   : > { %2828 = vmatprep.mubr.bf16.mxu1 %v3104_v49  ;;  %v2945_v49 = vld [vmem:[%s3420_s3 + $0x188] sm:$0xff]  }
  0x8d   : > { %2795 = vmatpush3.bf16.msra.mxu0 %v2939_v39 }
  0x8e   : > { %2819 = vmatpush3.bf16.msra.mxu1 %v2940_v38  ;;  %2796 = vmatprep.subr.bf16.mxu0 %v2941_v2 }
  0x8f   : > { %2820 = vmatprep.subr.bf16.mxu1 %v2942_v1 }
  0x91   : > { %2797 = vmatpush3.bf16.msra.mxu0 %v2941_v2 }
  0x92   : > { %2821 = vmatpush3.bf16.msra.mxu1 %v2942_v1  ;;  %2798 = vmatprep.subr.bf16.mxu0 %v2943_v7 }
  0x93   : > { %2822 = vmatprep.subr.bf16.mxu1 %v2944_v3 }
  0x95   : > { %2799 = vmatpush3.bf16.msra.mxu0 %v2943_v7 }
  0x96   : > { %2823 = vmatpush3.bf16.msra.mxu1 %v2944_v3  ;;  %2800 = vmatprep.subr.bf16.mxu0 %v2945_v49 }
  0x97   : > { %2824 = vmatprep.subr.bf16.mxu1 %v2946_v62 }
  0x99   : > { %2801 = vmatpush3.bf16.msra.mxu0 %v2945_v49 }
  0x9a   : > { %2825 = vmatpush3.bf16.msra.mxu1 %v2946_v62  ;;  %2802 = vmatprep.subr.bf16.mxu0 %v2947_v20 }
  0x9b   : > { %2826 = vmatprep.subr.bf16.mxu1 %v2948_v9 }
  0x9d   : > { %2803 = vmatpush3.bf16.msra.mxu0 %v2947_v20 }
  0x9e   : > { %2827 = vmatpush3.bf16.msra.mxu1 %v2948_v9  ;;  %2836 = vmatprep.subr.bf16.mxu0 %v2949_v23 }
  0x9f   : > { %2860 = vmatprep.subr.bf16.mxu1 %v2949_v23 }
  0xa0   : > { %2805 = vmatmul.mubr.bf16.vlgmr.msra.gmra.mxu0 %v3173_v21  ;;  %v2952_v21 = vld [vmem:[%s3420_s3 + $0x220] sm:$0xff]  }
  0xa1   : > { %2829 = vmatmul.mubr.bf16.vlgmr.msra.gmra.mxu1 %v3137_v6  ;;  %2837 = vmatpush3.bf16.msra.mxu0 %v2949_v23  ;;  %v2477_v6 = vpack.c.bf16 %v1467_v26, %v3236_v51 }
  0xa2   : > { %2868 = vmatpush3.bf16.msra.mxu1 %v2949_v23  ;;  %2838 = vmatprep.subr.bf16.mxu0 %v2950_v24 }
  0xa3   : > { %2861 = vmatprep.subr.bf16.mxu1 %v2950_v24  ;;  %2808 = vmatprep.mubr.bf16.mxu0 %v3177_v22  ;;  %v2955_v22 = vld [vmem:[%s3420_s3 + $0x208] sm:$0xff]  }
  0xa4   : > { %2832 = vmatprep.mubr.bf16.mxu1 %v3152_v10  ;;  %v2953_v10 = vld [vmem:[%s3420_s3 + $0x218] sm:$0xff]  }
  0xa5   : > { %2839 = vmatpush3.bf16.msra.mxu0 %v2950_v24 }
  0xa6   : > { %2869 = vmatpush3.bf16.msra.mxu1 %v2950_v24  ;;  %2840 = vmatprep.subr.bf16.mxu0 %v2951_v27 }
  0xa7   : > { %2862 = vmatprep.subr.bf16.mxu1 %v2951_v27 }
  0xa8   : > { %2809 = vmatmul.mubr.bf16.gmra.mxu0 %v2477_v6 }
  0xa9   : > { %2833 = vmatmul.mubr.bf16.gmra.mxu1 %v2481_v28  ;;  %2841 = vmatpush3.bf16.msra.mxu0 %v2951_v27 }
  0xaa   : > { %2870 = vmatpush3.bf16.msra.mxu1 %v2951_v27  ;;  %2842 = vmatprep.subr.bf16.mxu0 %v2952_v21 }
  0xab   : > { %2863 = vmatprep.subr.bf16.mxu1 %v2952_v21  ;;  %2852 = vmatprep.mubr.bf16.mxu0 %v3217_v43 }
  0xac   : > { %2856 = vmatprep.mubr.bf16.mxu1 %v3249_v55 }
  0xad   : > { %2843 = vmatpush3.bf16.msra.mxu0 %v2952_v21 }
  0xae   : > { %2871 = vmatpush3.bf16.msra.mxu1 %v2952_v21  ;;  %2844 = vmatprep.subr.bf16.mxu0 %v2953_v10 }
  0xaf   : > { %2864 = vmatprep.subr.bf16.mxu1 %v2953_v10 }
  0xb1   : > { %2845 = vmatpush3.bf16.msra.mxu0 %v2953_v10 }
  0xb2   : > { %2872 = vmatpush3.bf16.msra.mxu1 %v2953_v10  ;;  %2846 = vmatprep.subr.bf16.mxu0 %v2954_v4 }
  0xb3   : > { %2865 = vmatprep.subr.bf16.mxu1 %v2954_v4 }
  0xb5   : > { %2847 = vmatpush3.bf16.msra.mxu0 %v2954_v4 }
  0xb6   : > { %2873 = vmatpush3.bf16.msra.mxu1 %v2954_v4  ;;  %2848 = vmatprep.subr.bf16.mxu0 %v2955_v22 }
  0xb7   : > { %2866 = vmatprep.subr.bf16.mxu1 %v2955_v22 }
  0xb9   : > { %2849 = vmatpush3.bf16.msra.mxu0 %v2955_v22 }
  0xba   : > { %2874 = vmatpush3.bf16.msra.mxu1 %v2955_v22  ;;  %2850 = vmatprep.subr.bf16.mxu0 %v2956_v29 }
  0xbb   : > { %2867 = vmatprep.subr.bf16.mxu1 %v2956_v29 }
  0xbd   : > { %2851 = vmatpush3.bf16.msra.mxu0 %v2956_v29 }
  0xbe   : > { %2875 = vmatpush3.bf16.msra.mxu1 %v2956_v29 }
  0xc0   : > { %2853 = vmatmul.mubr.bf16.vlgmr.msra.gmra.mxu0 %v3227_v46 }
  0xc1   : > { %2857 = vmatmul.mubr.bf16.vlgmr.msra.gmra.mxu1 %v2485_v31 }
 0x100   : > { %v2662_v34 = vpop.f32.mrf.mxu0 }
 0x101   : > { %v2686_v36 = vpop.f32.mrf.mxu1 }
 0x102   : > { %v450_v37 = vpop.f32.mrf.mxu0  ;;  %v669_v10 = vadd.f32 %v2686_v36, %v2662_v34 }
 0x103   : > { %v628_v40 = vpop.f32.mrf.mxu1 }
 0x104   : > { %v2663_v41 = vpop.f32.mrf.mxu0  ;;  %v667_v4 = vadd.f32 %v628_v40, %v450_v37 }
 0x105   : > { %v2687_v42 = vpop.f32.mrf.mxu1 }
 0x106   : > { %v453_v43 = vpop.f32.mrf.mxu0  ;;  %v670_v22 = vadd.f32 %v2687_v42, %v2663_v41 }
 0x107   : > { %v631_v44 = vpop.f32.mrf.mxu1 }
 0x108   : > { %v2666_v45 = vpop.f32.mrf.mxu0 }
 0x109   : > { %v2690_v47 = vpop.f32.mrf.mxu1 }
 0x10a   : > { %v466_v48 = vpop.f32.mrf.mxu0  ;;  %v673_v6 = vadd.f32 %v2690_v47, %v2666_v45 }
 0x10b   : > { %v644_v50 = vpop.f32.mrf.mxu1 }
 0x10c   : > { %v2667_v51 = vpop.f32.mrf.mxu0  ;;  %v671_v31 = vadd.f32 %v644_v50, %v466_v48 }
 0x10d   : > { %v2691_v52 = vpop.f32.mrf.mxu1 }
 0x10e   : > { %v469_v53 = vpop.f32.mrf.mxu0  ;;  %v674_v21 = vadd.f32 %v2691_v52, %v2667_v51 }
 0x10f   : > { %v647_v54 = vpop.f32.mrf.mxu1 }
 0x120   : > { %v2710_v55 = vpop.f32.mrf.mxu0 }
 0x121   : > { %v2734_v56 = vpop.f32.mrf.mxu1 }
 0x122   : > { %v822_v57 = vpop.f32.mrf.mxu0 }
 0x123   : > { %v1016_v46 = vpop.f32.mrf.mxu1 }
 0x124   : > { %v2711_v58 = vpop.f32.mrf.mxu0 }
 0x125   : > { %v2735_v59 = vpop.f32.mrf.mxu1  ;;  %v864_v45 = vadd.f32 %v2711_v58, %v670_v22 }
 0x126   : > { %v825_v60 = vpop.f32.mrf.mxu0 }
 0x127   : > { %v1019_v61 = vpop.f32.mrf.mxu1  ;;  %v1058_v48 = vadd.f32 %v2735_v59, %v864_v45 }
 0x128   : > { %v2714_v32 = vpop.f32.mrf.mxu0 }
 0x129   : > { %v2738_v33 = vpop.f32.mrf.mxu1 }
 0x12a   : > { %v838_v63 = vpop.f32.mrf.mxu0 }
 0x12b   : > { %v1032_v0 = vpop.f32.mrf.mxu1  ;;  %v865_v47 = vadd.f32 %v838_v63, %v671_v31 }
 0x12c   : > { %v2715_v5 = vpop.f32.mrf.mxu0 }
 0x12d   : > { %v2739_v8 = vpop.f32.mrf.mxu1  ;;  %v1059_v50 = vadd.f32 %v1032_v0, %v865_v47 }
 0x12e   : > { %v841_v11 = vpop.f32.mrf.mxu0 }
 0x12f   : > { %v1035_v12 = vpop.f32.mrf.mxu1 }
 0x140   : > { %v2758_v13 = vpop.f32.mrf.mxu0 }
 0x141   : > { %v3386_v14 = vpop.f32.mrf.mxu1 }
 0x142   : > { %3423 = vst [vmem:[#allocation4_spill] sm:$0xff] %v3386_v14  ;;  %v1210_v15 = vpop.f32.mrf.mxu0  ;;  %v867_v14 = vadd.f32 %v2714_v32, %v673_v6 }
 0x143   : > { %v1404_v16 = vpop.f32.mrf.mxu1 }
 0x144   : > { %v2759_v17 = vpop.f32.mrf.mxu0  ;;  %v1061_v37 = vadd.f32 %v2738_v33, %v867_v14 }
 0x145   : > { %v2783_v18 = vpop.f32.mrf.mxu1 }
 0x146   : > { %v1213_v19 = vpop.f32.mrf.mxu0 }
 0x147   : > { %v3388_v35 = vpop.f32.mrf.mxu1 }
 0x148   : > { %3424 = vst [vmem:[#allocation5_spill] sm:$0xff] %v3388_v35  ;;  %v2762_v38 = vpop.f32.mrf.mxu0  ;;  %v672_v35 = vadd.f32 %v647_v54, %v469_v53 }
 0x149   : > { %v2786_v39 = vpop.f32.mrf.mxu1  ;;  %v1255_v54 = vadd.f32 %v2762_v38, %v1061_v37  ;;  %v3429_v33 = vld [vmem:[#allocation4_spill] sm:$0xff] }
 0x14a   : > { %v1226_v1 = vpop.f32.mrf.mxu0  ;;  %v866_v51 = vadd.f32 %v841_v11, %v672_v35 }
 0x14b   : > { %v1420_v2 = vpop.f32.mrf.mxu1  ;;  %v1253_v58 = vadd.f32 %v1226_v1, %v1059_v50  ;;  %v1449_v11 = vadd.f32 %v2786_v39, %v1255_v54 }
 0x14c   : > { %v2763_v3 = vpop.f32.mrf.mxu0  ;;  %v1060_v53 = vadd.f32 %v1035_v12, %v866_v51 }
 0x14d   : > { %v2787_v7 = vpop.f32.mrf.mxu1  ;;  %v1447_v12 = vadd.f32 %v1420_v2, %v1253_v58 }
 0x14e   : > { %v1229_v62 = vpop.f32.mrf.mxu0 }
 0x14f   : > { %v1423_v49 = vpop.f32.mrf.mxu1  ;;  %v1254_v63 = vadd.f32 %v1229_v62, %v1060_v53 }
 0x151   : > { %v1448_v14 = vadd.f32 %v1423_v49, %v1254_v63 }
 0x160   : > { %v2806_v9 = vpop.f32.mrf.mxu0 }
 0x161   : > { %v3390_v20 = vpop.f32.mrf.mxu1 }
 0x162   : > { %3425 = vst [vmem:[#allocation6_spill] sm:$0xff] %v3390_v20  ;;  %v1599_v23 = vpop.f32.mrf.mxu0  ;;  %v868_v20 = vadd.f32 %v2715_v5, %v674_v21 }
 0x163   : > { %v3392_v24 = vpop.f32.mrf.mxu1 }
 0x164   : > { %3426 = vst [vmem:[#allocation7_spill] sm:$0xff] %v3392_v24  ;;  %v2807_v25 = vpop.f32.mrf.mxu0  ;;  %v668_v24 = vadd.f32 %v631_v44, %v453_v43  ;;  %v1062_v40 = vadd.f32 %v2739_v8, %v868_v20  ;;  %v1252_v44 = vadd.f32 %v2759_v17, %v1058_v48 }
 0x165   : > { %v3394_v26 = vpop.f32.mrf.mxu1 }
 0x166   : > { %3427 = vst [vmem:[#allocation8_spill] sm:$0xff] %v3394_v26  ;;  %v1602_v27 = vpop.f32.mrf.mxu0  ;;  %v863_v26 = vadd.f32 %v2710_v55, %v669_v10  ;;  %v862_v52 = vadd.f32 %v825_v60, %v668_v24  ;;  %v1256_v6 = vadd.f32 %v2763_v3, %v1062_v40 }
 0x167   : > { %v3396_v28 = vpop.f32.mrf.mxu1 }
 0x168   : > { %3428 = vst [vmem:[#allocation9_spill] sm:$0xff] %v3396_v28  ;;  %v2810_v29 = vpop.f32.mrf.mxu0  ;;  %v861_v28 = vadd.f32 %v822_v57, %v667_v4  ;;  %v1057_v41 = vadd.f32 %v2734_v56, %v863_v26  ;;  %v1056_v32 = vadd.f32 %v1019_v61, %v862_v52  ;;  %v1450_v35 = vadd.f32 %v2787_v7, %v1256_v6 }
 0x169   : > { %v2834_v30 = vpop.f32.mrf.mxu1  ;;  %v1644_v38 = vadd.f32 %v2810_v29, %v1449_v11 }
 0x16a   : > { %v1615_v34 = vpop.f32.mrf.mxu0  ;;  %v1055_v42 = vadd.f32 %v1016_v46, %v861_v28  ;;  %v1251_v5 = vadd.f32 %v2758_v13, %v1057_v41  ;;  %v1250_v60 = vadd.f32 %v1213_v19, %v1056_v32  ;;  %v1446_v46 = vadd.f32 %v2783_v18, %v1252_v44  ;;  %v3430_v13 = vld [vmem:[#allocation5_spill] sm:$0xff]  ;;  %v3431_v28 = vld [vmem:[#allocation6_spill] sm:$0xff] }
 0x16b   : > { %v1809_v36 = vpop.f32.mrf.mxu1  ;;  %v1642_v62 = vadd.f32 %v1615_v34, %v1447_v12  ;;  %v1838_v26 = vadd.f32 %v2834_v30, %v1644_v38  ;;  %v3432_v2 = vld [vmem:[#allocation7_spill] sm:$0xff] }
 0x16c   : > { %v1249_v43 = vadd.f32 %v1210_v15, %v1055_v42  ;;  %v2811_v55 = vpop.f32.mrf.mxu0  ;;  %v1445_v8 = vadd.f32 %v3429_v33, %v1251_v5  ;;  %v1444_v15 = vadd.f32 %v3430_v13, %v1250_v60  ;;  %v1641_v20 = vadd.f32 %v2807_v25, %v1446_v46 }
 0x16d   : > { %v2835_v57 = vpop.f32.mrf.mxu1  ;;  %v1645_v61 = vadd.f32 %v2811_v55, %v1450_v35  ;;  %v3433_v10 = vld [vmem:[#allocation8_spill] sm:$0xff]  ;;  %v1836_v29 = vadd.f32 %v1809_v36, %v1642_v62 }
 0x16e   : > { %v1443_v56 = vadd.f32 %v1404_v16, %v1249_v43  ;;  %v1618_v59 = vpop.f32.mrf.mxu0  ;;  %v1640_v17 = vadd.f32 %v2806_v9, %v1445_v8  ;;  %v1639_v7 = vadd.f32 %v1602_v27, %v1444_v15  ;;  %v1835_v4 = vadd.f32 %v3433_v10, %v1641_v20 }
 0x16f   : > { %v1812_v0 = vpop.f32.mrf.mxu1  ;;  %v1643_v19 = vadd.f32 %v1618_v59, %v1448_v14  ;;  %v1839_v16 = vadd.f32 %v2835_v57, %v1645_v61  ;;  %v3434_v45 = vld [vmem:[#allocation9_spill] sm:$0xff] }
 0x170   : > { %v1638_v3 = vadd.f32 %v1599_v23, %v1443_v56  ;;  %v1834_v21 = vadd.f32 %v3431_v28, %v1640_v17  ;;  %v1833_v27 = vadd.f32 %v3434_v45, %v1639_v7 }
 0x171   : > { %v1837_v9 = vadd.f32 %v1812_v0, %v1643_v19 }
 0x172   : > { %v1832_v49 = vadd.f32 %v3432_v2, %v1638_v3 }
 0x180   : > { %v2854_v39 = vpop.f32.mrf.mxu0 }
 0x181   : > { %v2858_v1 = vpop.f32.mrf.mxu1  ;;  %v2028_v47 = vadd.f32 %v2854_v39, %v1834_v21  ;;  %v2090_v39 = vld [vmem:[%s3422_s5] sm:$0x3] }
 0x182   : > { %v1987_v18 = vpop.f32.mrf.mxu0  ;;  %v2032_v23 = vadd.f32 %v2858_v1, %v1838_v26 }
 0x183   : > { %v2003_v24 = vpop.f32.mrf.mxu1  ;;  %v2026_v30 = vadd.f32 %v1987_v18, %v1832_v49  ;;  %v2106_v32 = vmul.f32 %v2028_v47, %v2028_v47 }
 0x184   : > { %v2855_v25 = vpop.f32.mrf.mxu0  ;;  %v2030_v34 = vadd.f32 %v2003_v24, %v1836_v29  ;;  %v2110_v8 = vmul.f32 %v2032_v23, %v2032_v23 }
 0x185   : > { %v2859_v22 = vpop.f32.mrf.mxu1  ;;  %v2029_v51 = vadd.f32 %v2855_v25, %v1835_v4  ;;  %v2104_v50 = vmul.f32 %v2026_v30, %v2026_v30 }
 0x186   : > { %v2033_v31 = vadd.f32 %v2859_v22, %v1839_v16  ;;  %v1990_v40 = vpop.f32.mrf.mxu0  ;;  %v2108_v58 = vmul.f32 %v2030_v34, %v2030_v34 }
 0x187   : > { %v2006_v52 = vpop.f32.mrf.mxu1  ;;  %v2518_v42 = vpack.c.bf16 %v2029_v51, %v2028_v47  ;;  %v2027_v36 = vadd.f32 %v1990_v40, %v1833_v27  ;;  %v2107_v44 = vmul.f32 %v2029_v51, %v2029_v51 }
 0x188   : > { %v2528_v37 = vpack.c.bf16 %v2033_v31, %v2032_v23  ;;  %v2031_v41 = vadd.f32 %v2006_v52, %v1837_v9  ;;  %v2111_v59 = vmul.f32 %v2033_v31, %v2033_v31 }
 0x189   : > { %2533 = vst [vmem:[%s3012_s27 + $0x8] sm:$0xff] %v2518_v42   ;;  %v2513_v53 = vpack.c.bf16 %v2027_v36, %v2026_v30  ;;  %v2091_v54 = vadd.f32 %v2027_v36, %v2026_v30  ;;  %v2105_v6 = vmul.f32 %v2027_v36, %v2027_v36 }
 0x18a   : > { %2535 = vst [vmem:[%s3012_s27 + $0x18] sm:$0xff] %v2528_v37   ;;  %v2523_v48 = vpack.c.bf16 %v2031_v41, %v2030_v34  ;;  %v2109_v35 = vmul.f32 %v2031_v41, %v2031_v41 }
 0x18b   : > { %2514 = vst [vmem:[%s3012_s27] sm:$0xff] %v2513_v53   ;;  %v2092_v5 = vadd.f32 %v2091_v54, %v2028_v47  ;;  %v2112_v43 = vadd.f32 %v2105_v6, %v2104_v50 }
 0x18c   : > { %2534 = vst [vmem:[%s3012_s27 + $0x10] sm:$0xff] %v2523_v48  }
 0x18d   : > { %v2113_v55 = vadd.f32 %v2112_v43, %v2106_v32  ;;  %v2093_v57 = vadd.f32 %v2092_v5, %v2029_v51 }
 0x18f   : > { %v2094_v63 = vadd.f32 %v2093_v57, %v2030_v34  ;;  %v2114_v60 = vadd.f32 %v2113_v55, %v2107_v44 }
 0x191   : > { %v2095_v11 = vadd.f32 %v2094_v63, %v2031_v41  ;;  %v2115_v33 = vadd.f32 %v2114_v60, %v2108_v58 }
 0x193   : > { %v2096_v56 = vadd.f32 %v2095_v11, %v2032_v23  ;;  %v2116_v46 = vadd.f32 %v2115_v33, %v2109_v35 }
 0x195   : > { %v2097_v0 = vadd.f32 %v2096_v56, %v2033_v31  ;;  %v2117_v12 = vadd.f32 %v2116_v46, %v2110_v8 }
 0x197   : > { %v2098_v14 = vrot.slane %v2097_v0, 4  ;;  %v2118_v38 = vadd.f32 %v2117_v12, %v2111_v59 }
 0x199   : > { %v2099_v61 = vadd.f32 %v2098_v14, %v2097_v0  ;;  %v2119_v13 = vrot.slane %v2118_v38, 4 }
 0x19b   : > { %v2100_v15 = vrot.slane %v2099_v61, 2  ;;  %v2120_v17 = vadd.f32 %v2119_v13, %v2118_v38 }
 0x19d   : > { %v2101_v3 = vadd.f32 %v2100_v15, %v2099_v61  ;;  %v2121_v20 = vrot.slane %v2120_v17, 2 }
 0x19f   : > { %v2102_v1 = vrot.slane %v2101_v3, 1  ;;  %v2122_v62 = vadd.f32 %v2121_v20, %v2120_v17 }
 0x1a1   : > { %v2123_v19 = vrot.slane %v2122_v62, 1  ;;  %v2103_v7 = vadd.f32 %v2102_v1, %v2101_v3 }
 0x1a3   : > { %v2124_v24 = vadd.f32 %v2123_v19, %v2122_v62 }
 0x1a5   : > { %v2126_v26 = vsel %vm2125_vm0, %v2103_v7, %v2124_v24 }
 0x1a6   : > { %v2127_v16 = vadd.f32 %v2126_v26, %v2090_v39 }
 0x1a8   : > { %2128 = vst [vmem:[%s3422_s5] sm:$0x3] %v2127_v16 }
 0x1a9 PF: > { %s16_s18 = sadd.s32 1, %s2963_s18  }
 0x1aa   : > { %p13_p5 = scmp.ge.s32.totalorder %s16_s18, 4  }
 0x1ac   :  { %15 = sbr.rel (!%p13_p5) target bundleno = 1 (0x1), region = 88 }

</bundles_post_ra>
